<compile_context>
chip_gen: v5e
topology: v5e:2x2
jax: 0.10.0
libtpu: 0.0.40
codegen_flags: <defaults>
</compile_context>

<pallas_src>
import functools

import jax
import jax.numpy as jnp
from jax.experimental import pallas as pl
from jax.experimental.pallas import tpu as pltpu

COMPUTE_DTYPE = jnp.bfloat16


# ---------------------------------------------------------------------------
# Fused-chain kernel
# ---------------------------------------------------------------------------
def _fused_chain_kernel(*refs, n_blocks, proj_flags):
    """Whole residual-block chain for one packed batch group (VMEM-resident).

    refs = (x_ref, keep_ref,
            [w1_edges, w1_mid, b1, wb2, b2] * n_blocks,
            o_ref, scr_ref)

    x_ref   : (1, Hs, W*Cin)  bf16 packed slab (zero separator / halo rows)
    keep_ref: (Hs-2, 1)       f32  1.0 on real rows, 0.0 on separator/pad rows
    o_ref   : (1, Hs, W*Cout) f32
    scr_ref : (Hs, W*Cout)    f32  activation scratch; rows 0 / Hs-1 stay zero
                                   (they are the SAME-padding halo for row taps)
    """
    x_ref, keep_ref = refs[0], refs[1]
    o_ref, scr_ref = refs[-2], refs[-1]
    wrefs = refs[2:-2]

    f32, bf16 = jnp.float32, jnp.bfloat16
    Hs = scr_ref.shape[0]
    Hc = Hs - 2                                   # computed rows = slab rows 1..Hs-2
    keep = keep_ref[...]                          # (Hc, 1) f32 row mask

    # Zero the scratch once per grid step; rows 0 and Hs-1 are never written
    # again, so they remain the zero halo for every block's row taps.
    scr_ref[...] = jnp.zeros(scr_ref.shape, f32)

    sc_prev = None            # previous block's f32 output (identity shortcuts)
    for blk in range(n_blocks):
        w1e_ref, w1m_ref, b1_ref, wb2_ref, b2_ref = wrefs[5 * blk: 5 * blk + 5]
        N = wb2_ref.shape[-1]

        # ---- conv1 (3x3 SAME) = 3 banded tap matmuls on shifted row windows --
        if blk == 0:
            def tap(off):
                return x_ref[0, pl.ds(off, Hc), :]               # bf16 input slab
        else:
            def tap(off):
                return scr_ref[pl.ds(off, Hc), :].astype(bf16)   # prev block output

        x_mid = tap(1)
        mid = jnp.dot(x_mid, w1m_ref[...], preferred_element_type=f32)
        if proj_flags[blk]:
            # 1x1 projection shortcut fused into conv1's middle tap (N -> 2N wide).
            acc, sc = mid[:, :N], mid[:, N:]
        else:
            acc = mid
            sc = sc_prev if sc_prev is not None else x_mid.astype(f32)
        acc = acc + jnp.dot(tap(0), w1e_ref[0], preferred_element_type=f32)
        acc = acc + jnp.dot(tap(2), w1e_ref[1], preferred_element_type=f32)
        acc = acc + b1_ref[...]
        a = acc * jax.nn.sigmoid(acc)             # SiLU in f32 (EUP)
        a = a * keep                              # re-zero separator / pad rows
        scr_ref[pl.ds(1, Hc), :] = a              # conv2 tap source

        # ---- conv2 (3x3 SAME) + shortcut -------------------------------------
        # TODO(synk): on v7x, merging the 3 taps into one K=3*W*C dot would let
        # the MRB accumulate in place; kept as 3 dots + cheap VPU adds here.
        def tap2(off):
            return scr_ref[pl.ds(off, Hc), :].astype(bf16)

        acc2 = jnp.dot(tap2(1), wb2_ref[1], preferred_element_type=f32)
        acc2 = acc2 + jnp.dot(tap2(0), wb2_ref[0], preferred_element_type=f32)
        acc2 = acc2 + jnp.dot(tap2(2), wb2_ref[2], preferred_element_type=f32)
        y = (acc2 + b2_ref[...] + sc) * keep      # masked block output, f32

        if blk + 1 < n_blocks:
            scr_ref[pl.ds(1, Hc), :] = y          # next block's conv1 source
            sc_prev = y
        else:
            o_ref[0, pl.ds(1, Hc), :] = y.astype(o_ref.dtype)
            zrow = jnp.zeros((1, N), o_ref.dtype)
            o_ref[0, pl.ds(0, 1), :] = zrow       # keep halo rows deterministic
            o_ref[0, pl.ds(Hs - 1, 1), :] = zrow


# ---------------------------------------------------------------------------
# pallas_call wrapper
# ---------------------------------------------------------------------------
def _const_spec(shape):
    """BlockSpec for an operand identical at every grid step (loaded once)."""
    zeros = (0,) * len(shape)
    return pl.BlockSpec(shape, lambda g, _z=zeros: _z)


def _run_fused_chain(x_packed, keep_mask, flat_w, proj_flags, *, WCout):
    G, Hs, WCin = x_packed.shape
    n_blocks = len(proj_flags)
    Hc = Hs - 2

    kernel = functools.partial(_fused_chain_kernel, n_blocks=n_blocks,
                               proj_flags=proj_flags)

    in_specs = [pl.BlockSpec((1, Hs, WCin), lambda g: (g, 0, 0)),
                _const_spec(keep_mask.shape)]
    in_specs += [_const_spec(w.shape) for w in flat_w]

    # ---- advisory cost estimate (helps XLA schedule neighbouring ops) -------
    flops = 0
    transcendentals = 0
    for b in range(n_blocks):
        w1e, w1m, _b1, wb2, _b2 = flat_w[5 * b: 5 * b + 5]
        K, N = w1e.shape[1], wb2.shape[-1]
        flops += 2 * Hc * (2 * K * N + K * w1m.shape[-1] + 3 * N * N)
        transcendentals += Hc * N
    flops *= G
    transcendentals *= G
    w_bytes = sum(w.size * w.dtype.itemsize for w in flat_w)
    bytes_accessed = (x_packed.size * x_packed.dtype.itemsize
                      + w_bytes + G * Hs * WCout * 4)

    # ---- VMEM budget guard (v7x has only 64 MiB; bands grow O(W^2*Cin*Cout)) -
    est_vmem = (2 * w_bytes                              # (double-buffered) weights
                + 2 * Hs * WCin * 2 + 2 * Hs * WCout * 4  # x / out blocks
                + Hs * WCout * 4                          # scratch
                + 8 * Hc * WCout * 4)                     # live f32 temporaries
    assert est_vmem < 40 * 1024 * 1024, (
        "banded conv weights / activation slab too large for VMEM; tile the "
        "width (W) or fall back to per-kw-tap matmuls")
    vmem_limit = int(min(max(2 * est_vmem, 4 * 1024 * 1024), 48 * 1024 * 1024))

    return pl.pallas_call(
        kernel,
        out_shape=jax.ShapeDtypeStruct((G, Hs, WCout), jnp.float32),
        grid=(G,),
        in_specs=in_specs,
        out_specs=pl.BlockSpec((1, Hs, WCout), lambda g: (g, 0, 0)),
        scratch_shapes=[pltpu.VMEM((Hs, WCout), jnp.float32)],
        compiler_params=pltpu.CompilerParams(
            dimension_semantics=("parallel",),
            vmem_limit_bytes=vmem_limit),
        cost_estimate=pl.CostEstimate(flops=int(flops),
                                      transcendentals=int(transcendentals),
                                      bytes_accessed=int(bytes_accessed)),
    )(x_packed, keep_mask, *flat_w)


# ---------------------------------------------------------------------------
# Parameter preparation (hoisted out of the forward hot path)
# ---------------------------------------------------------------------------
def _make_bands(p, W, compute_dtype):
    """Fold the kw taps + width zero-padding into banded weight matrices.

    band[kh][(w_in*Cin + ci), (w_out*Cout + co)] = w[kh, kw, ci, co]
      with kw = w_in - w_out + 1; entries with w_in outside [0, W) are absent
      (== SAME zero-padding along width).
    """
    w1, b1, w2, b2, ws = p["w1"], p["b1"], p["w2"], p["b2"], p["ws"]
    Cout = w1.shape[-1]

    taps = jnp.arange(3)
    w_in = jnp.arange(W)
    w_out = jnp.arange(W)
    sel = (w_in[None, :, None] ==
           (w_out[None, None, :] + taps[:, None, None] - 1)).astype(jnp.float32)

    def band(w):  # (3, 3, Cin, Cout) -> (3, W*Cin, W*Cout)
        Cin = w.shape[2]
        m = jnp.einsum("kab,hkio->haibo", sel, w.astype(jnp.float32))
        return m.reshape(3, W * Cin, W * Cout).astype(compute_dtype)

    band1, band2 = band(w1), band(w2)
    bias1 = jnp.tile(b1, W).reshape(1, W * Cout).astype(jnp.float32)
    bias2 = jnp.tile(b2, W).reshape(1, W * Cout).astype(jnp.float32)

    ws_band = None
    if ws is not None:
        Cin = ws.shape[0]
        ws_band = jnp.einsum("ab,io->aibo", jnp.eye(W, dtype=jnp.float32),
                             ws.astype(jnp.float32))
        ws_band = ws_band.reshape(W * Cin, W * Cout).astype(compute_dtype)
    return band1, bias1, band2, bias2, ws_band


def prepare_residual_layer_params(params, W, compute_dtype=COMPUTE_DTYPE):
    """Build banded weights ONCE (call outside the jitted forward)."""
    prepared = []
    for p in params:
        band1, bias1, band2, bias2, ws_band = _make_bands(p, W, compute_dtype)
        w1_edges = jnp.stack([band1[0], band1[2]], axis=0)       # kh = 0 and 2
        if ws_band is None:
            w1_mid = band1[1]                                    # identity shortcut
        else:
            # Fuse the 1x1 projection shortcut into conv1's middle tap (N -> 2N).
            w1_mid = jnp.concatenate([band1[1], ws_band], axis=-1)
        prepared.append(dict(w1_edges=w1_edges, w1_mid=w1_mid, b1=bias1,
                             wb2=band2, b2=bias2))
    return prepared


def init_residual_layer_params(key, in_channels, out_channels, n_blocks=2):
    """Deterministic parameter init for the block chain (HWIO conv weights)."""
    params = []
    cin = in_channels
    for _ in range(n_blocks):
        key, k1, k2, k3, k4, k5 = jax.random.split(key, 6)
        w1 = jax.random.normal(k1, (3, 3, cin, out_channels), jnp.float32) * 0.1
        b1 = jax.random.normal(k4, (out_channels,), jnp.float32) * 0.1
        w2 = jax.random.normal(k2, (3, 3, out_channels, out_channels),
                               jnp.float32) * 0.1
        b2 = jax.random.normal(k5, (out_channels,), jnp.float32) * 0.1
        ws = (jax.random.normal(k3, (cin, out_channels), jnp.float32) * 0.1
              if cin != out_channels else None)   # None => identity shortcut
        params.append(dict(w1=w1, b1=b1, w2=w2, b2=b2, ws=ws))
        cin = out_channels
    return params


# ---------------------------------------------------------------------------
# Packing / forward
# ---------------------------------------------------------------------------
def _round_up(n, m):
    return ((n + m - 1) // m) * m


def _choose_batch_group(B, H, target_rows=256):
    """Largest divisor of B whose packed slab is at most ~target_rows tall
    (targets the 128/256-row MXU; at least 1)."""
    bb = 1
    for cand in range(1, B + 1):
        if B % cand == 0 and 1 + cand * (H + 1) <= target_rows:
            bb = cand
    return bb


def _pack_input(x_nchw, Bb, Hs):
    """NCHW -> (groups, Hs, W*C) bf16 slabs: lane-dense, one zero separator row
    per sample, one leading zero row, zero tail padding to Hs rows."""
    B, C, H, W = x_nchw.shape
    G = B // Bb
    period = H + 1
    x = jnp.transpose(x_nchw, (0, 2, 3, 1)).reshape(B, H, W * C)
    x = x.astype(COMPUTE_DTYPE)
    x = jnp.pad(x, ((0, 0), (0, 1), (0, 0)))                 # per-sample zero row
    x = x.reshape(G, Bb * period, W * C)
    x = jnp.pad(x, ((0, 0), (1, Hs - 1 - Bb * period), (0, 0)))
    return x


def _unpack_output(y, B, Bb, H, W, Cout):
    period = H + 1
    y = y[:, 1:1 + Bb * period, :]              # drop leading zero row + tail pad
    y = y.reshape(B, period, W, Cout)[:, :H]    # drop per-sample separator row
    return jnp.transpose(y, (0, 3, 1, 2))       # NHWC -> NCHW


@jax.jit
def residual_layer_forward(x_nchw, prepared):
    """Equivalent of ResidualLayerABC.forward. Input/output are NCHW f32.

    `prepared` comes from prepare_residual_layer_params (hoisted weight prep).
    """
    B, _, H, W = x_nchw.shape
    WCout = prepared[-1]["wb2"].shape[-1]
    Cout = WCout // W

    Bb = _choose_batch_group(B, H)
    period = H + 1
    n_keep = 1 + Bb * period                    # leading zero row + Bb*(H+1) rows
    Hs = _round_up(n_keep, 16)                  # sublane-aligned slab height

    x_packed = _pack_input(x_nchw, Bb, Hs)      # (G, Hs, W*Cin) bf16

    rows = jnp.arange(1, Hs - 1, dtype=jnp.int32)
    keep = ((rows % period) != 0) & (rows < n_keep)
    keep_mask = keep.astype(jnp.float32).reshape(Hs - 2, 1)

    flat_w, proj_flags = [], []
    for p in prepared:
        proj_flags.append(p["w1_mid"].shape[-1] == 2 * p["wb2"].shape[-1])
        flat_w += [p["w1_edges"], p["w1_mid"], p["b1"], p["wb2"], p["b2"]]

    y = _run_fused_chain(x_packed, keep_mask, flat_w, tuple(proj_flags),
                         WCout=WCout)
    return _unpack_output(y, B, Bb, H, W, Cout)


# ---------------------------------------------------------------------------
# Pure-JAX reference (f32) for validation
# ---------------------------------------------------------------------------
def _reference_forward(x_nchw, params):
    h = jnp.transpose(x_nchw, (0, 2, 3, 1))
    for p in params:
        c1 = jax.lax.conv_general_dilated(
            h, p["w1"], window_strides=(1, 1), padding="SAME",
            dimension_numbers=("NHWC", "HWIO", "NHWC")) + p["b1"]
        a = c1 * jax.nn.sigmoid(c1)
        c2 = jax.lax.conv_general_dilated(
            a, p["w2"], window_strides=(1, 1), padding="SAME",
            dimension_numbers=("NHWC", "HWIO", "NHWC")) + p["b2"]
        sc = h if p["ws"] is None else jnp.einsum("bhwi,io->bhwo", h, p["ws"])
        h = c2 + sc
    return jnp.transpose(h, (0, 3, 1, 2))


if __name__ == "__main__":
    key = jax.random.PRNGKey(0)
    in_channels, out_channels, n_blocks = 4, 8, 2
    B, H, W = 2, 16, 16

    kx, kp = jax.random.split(key)
    x = jax.random.normal(kx, (B, in_channels, H, W), jnp.float32)
    params = init_residual_layer_params(kp, in_channels, out_channels, n_blocks)

    # Hoisted (one-time) banded-weight construction, per performance review.
    prepared = prepare_residual_layer_params(params, W)

    out = residual_layer_forward(x, prepared)
    jax.block_until_ready(out)
    assert out.shape == (B, out_channels, H, W), out.shape

    ref = _reference_forward(x, params)
    rel = float(jnp.max(jnp.abs(out - ref) / jnp.maximum(jnp.abs(ref), 1.0)))
    assert rel < 0.06, f"max relative err vs f32 reference: {rel}"  # bf16 tolerance
    print("KERNEL_OK")
</pallas_src>

<mosaic_0001>
module attributes {stable_mosaic.version = 11 : i64} {
  func.func @_fused_chain_kernel(%arg0: i32, %arg1: memref<1x48x64xbf16, #tpu.memory_space<vmem>>, %arg2: memref<46x1xf32, #tpu.memory_space<vmem>>, %arg3: memref<2x64x128xbf16, #tpu.memory_space<vmem>>, %arg4: memref<64x256xbf16, #tpu.memory_space<vmem>>, %arg5: memref<1x128xf32, #tpu.memory_space<vmem>>, %arg6: memref<3x128x128xbf16, #tpu.memory_space<vmem>>, %arg7: memref<1x128xf32, #tpu.memory_space<vmem>>, %arg8: memref<2x128x128xbf16, #tpu.memory_space<vmem>>, %arg9: memref<128x128xbf16, #tpu.memory_space<vmem>>, %arg10: memref<1x128xf32, #tpu.memory_space<vmem>>, %arg11: memref<3x128x128xbf16, #tpu.memory_space<vmem>>, %arg12: memref<1x128xf32, #tpu.memory_space<vmem>>, %arg13: memref<1x48x128xf32, #tpu.memory_space<vmem>>, %arg14: memref<48x128xf32, #tpu.memory_space<vmem>>) attributes {dimension_semantics = [#tpu.dimension_semantics<parallel>], iteration_bounds = array<i64: 1>, scalar_prefetch = 0 : i64, scratch_operands = 1 : i64, tpu.core_type = #tpu.core_type<tc>, window_params = [{transform_indices = @transform_0, window_bounds = array<i64: 1, 48, 64>}, {pipeline_mode = #tpu.pipeline_mode<synchronous>, transform_indices = @transform_1, window_bounds = array<i64: 46, 1>}, {pipeline_mode = #tpu.pipeline_mode<synchronous>, transform_indices = @transform_2, window_bounds = array<i64: 2, 64, 128>}, {pipeline_mode = #tpu.pipeline_mode<synchronous>, transform_indices = @transform_3, window_bounds = array<i64: 64, 256>}, {pipeline_mode = #tpu.pipeline_mode<synchronous>, transform_indices = @transform_4, window_bounds = array<i64: 1, 128>}, {pipeline_mode = #tpu.pipeline_mode<synchronous>, transform_indices = @transform_5, window_bounds = array<i64: 3, 128, 128>}, {pipeline_mode = #tpu.pipeline_mode<synchronous>, transform_indices = @transform_6, window_bounds = array<i64: 1, 128>}, {pipeline_mode = #tpu.pipeline_mode<synchronous>, transform_indices = @transform_7, window_bounds = array<i64: 2, 128, 128>}, {pipeline_mode = #tpu.pipeline_mode<synchronous>, transform_indices = @transform_8, window_bounds = array<i64: 128, 128>}, {pipeline_mode = #tpu.pipeline_mode<synchronous>, transform_indices = @transform_9, window_bounds = array<i64: 1, 128>}, {pipeline_mode = #tpu.pipeline_mode<synchronous>, transform_indices = @transform_10, window_bounds = array<i64: 3, 128, 128>}, {pipeline_mode = #tpu.pipeline_mode<synchronous>, transform_indices = @transform_11, window_bounds = array<i64: 1, 128>}, {transform_indices = @transform_12, window_bounds = array<i64: 1, 48, 128>}]} {
    %c0 = arith.constant 0 : index
    %c0_0 = arith.constant 0 : index
    %0 = vector.load %arg2[%c0, %c0_0] : memref<46x1xf32, #tpu.memory_space<vmem>>, vector<46x1xf32>
    %cst = arith.constant 0.000000e+00 : f32
    %1 = vector.broadcast %cst : f32 to vector<48x128xf32>
    %c0_1 = arith.constant 0 : index
    %c0_2 = arith.constant 0 : index
    %2 = vector.load %arg14[%c0_1, %c0_2] : memref<48x128xf32, #tpu.memory_space<vmem>>, vector<48x128xf32>
    tpu.vector_store %arg14[%c0_1, %c0_2], %1 {strides = array<i32>} : memref<48x128xf32, #tpu.memory_space<vmem>>, vector<48x128xf32>,
    %c0_3 = arith.constant 0 : index
    %c1 = arith.constant 1 : index
    %c0_4 = arith.constant 0 : index
    %3 = vector.load %arg1[%c0_3, %c1, %c0_4] : memref<1x48x64xbf16, #tpu.memory_space<vmem>>, vector<1x46x64xbf16>
    %4 = vector.shape_cast %3 : vector<1x46x64xbf16> to vector<46x64xbf16>
    %c0_5 = arith.constant 0 : index
    %c0_6 = arith.constant 0 : index
    %5 = vector.load %arg4[%c0_5, %c0_6] : memref<64x256xbf16, #tpu.memory_space<vmem>>, vector<64x256xbf16>
    %cst_7 = arith.constant dense<0.000000e+00> : vector<46x256xf32>
    %6 = tpu.matmul %4, %5, %cst_7 {dimension_numbers = #tpu.dot_dimension_numbers<[1], [0], [0], [1], [0, 0, 1, 1], [], []>} : vector<46x64xbf16>, vector<64x256xbf16>, vector<46x256xf32> -> vector<46x256xf32>
    %7 = vector.extract_strided_slice %6 {offsets = [0, 0], sizes = [46, 128], strides = [1, 1]} : vector<46x256xf32> to vector<46x128xf32>
    %8 = vector.extract_strided_slice %6 {offsets = [0, 128], sizes = [46, 128], strides = [1, 1]} : vector<46x256xf32> to vector<46x128xf32>
    %c0_8 = arith.constant 0 : index
    %c0_9 = arith.constant 0 : index
    %c0_10 = arith.constant 0 : index
    %9 = vector.load %arg1[%c0_8, %c0_9, %c0_10] : memref<1x48x64xbf16, #tpu.memory_space<vmem>>, vector<1x46x64xbf16>
    %10 = vector.shape_cast %9 : vector<1x46x64xbf16> to vector<46x64xbf16>
    %c0_11 = arith.constant 0 : index
    %c0_12 = arith.constant 0 : index
    %c0_13 = arith.constant 0 : index
    %11 = vector.load %arg3[%c0_11, %c0_12, %c0_13] : memref<2x64x128xbf16, #tpu.memory_space<vmem>>, vector<1x64x128xbf16>
    %12 = vector.shape_cast %11 : vector<1x64x128xbf16> to vector<64x128xbf16>
    %cst_14 = arith.constant dense<0.000000e+00> : vector<46x128xf32>
    %13 = tpu.matmul %10, %12, %cst_14 {dimension_numbers = #tpu.dot_dimension_numbers<[1], [0], [0], [1], [0, 0, 1, 1], [], []>} : vector<46x64xbf16>, vector<64x128xbf16>, vector<46x128xf32> -> vector<46x128xf32>
    %14 = arith.addf %7, %13 : vector<46x128xf32>
    %c0_15 = arith.constant 0 : index
    %c2 = arith.constant 2 : index
    %c0_16 = arith.constant 0 : index
    %15 = vector.load %arg1[%c0_15, %c2, %c0_16] : memref<1x48x64xbf16, #tpu.memory_space<vmem>>, vector<1x46x64xbf16>
    %16 = vector.shape_cast %15 : vector<1x46x64xbf16> to vector<46x64xbf16>
    %c1_17 = arith.constant 1 : index
    %c0_18 = arith.constant 0 : index
    %c0_19 = arith.constant 0 : index
    %17 = vector.load %arg3[%c1_17, %c0_18, %c0_19] : memref<2x64x128xbf16, #tpu.memory_space<vmem>>, vector<1x64x128xbf16>
    %18 = vector.shape_cast %17 : vector<1x64x128xbf16> to vector<64x128xbf16>
    %cst_20 = arith.constant dense<0.000000e+00> : vector<46x128xf32>
    %19 = tpu.matmul %16, %18, %cst_20 {dimension_numbers = #tpu.dot_dimension_numbers<[1], [0], [0], [1], [0, 0, 1, 1], [], []>} : vector<46x64xbf16>, vector<64x128xbf16>, vector<46x128xf32> -> vector<46x128xf32>
    %20 = arith.addf %14, %19 : vector<46x128xf32>
    %c0_21 = arith.constant 0 : index
    %c0_22 = arith.constant 0 : index
    %21 = vector.load %arg5[%c0_21, %c0_22] : memref<1x128xf32, #tpu.memory_space<vmem>>, vector<1x128xf32>
    %22 = vector.broadcast %21 : vector<1x128xf32> to vector<46x128xf32>
    %23 = arith.addf %20, %22 : vector<46x128xf32>
    %24 = arith.negf %23 : vector<46x128xf32>
    %25 = math.exp %24 : vector<46x128xf32>
    %cst_23 = arith.constant 1.000000e+00 : f32
    %26 = vector.broadcast %cst_23 : f32 to vector<46x128xf32>
    %27 = arith.addf %26, %25 : vector<46x128xf32>
    %28 = arith.divf %26, %27 : vector<46x128xf32>
    %29 = arith.mulf %23, %28 : vector<46x128xf32>
    %30 = vector.broadcast %0 : vector<46x1xf32> to vector<46x128xf32>
    %31 = arith.mulf %29, %30 : vector<46x128xf32>
    %c1_24 = arith.constant 1 : index
    %c0_25 = arith.constant 0 : index
    %32 = vector.load %arg14[%c1_24, %c0_25] : memref<48x128xf32, #tpu.memory_space<vmem>>, vector<46x128xf32>
    tpu.vector_store %arg14[%c1_24, %c0_25], %31 {strides = array<i32>} : memref<48x128xf32, #tpu.memory_space<vmem>>, vector<46x128xf32>,
    %c1_26 = arith.constant 1 : index
    %c0_27 = arith.constant 0 : index
    %33 = vector.load %arg14[%c1_26, %c0_27] : memref<48x128xf32, #tpu.memory_space<vmem>>, vector<46x128xf32>
    %34 = arith.truncf %33 : vector<46x128xf32> to vector<46x128xbf16>
    %c1_28 = arith.constant 1 : index
    %c0_29 = arith.constant 0 : index
    %c0_30 = arith.constant 0 : index
    %35 = vector.load %arg6[%c1_28, %c0_29, %c0_30] : memref<3x128x128xbf16, #tpu.memory_space<vmem>>, vector<1x128x128xbf16>
    %36 = vector.shape_cast %35 : vector<1x128x128xbf16> to vector<128x128xbf16>
    %cst_31 = arith.constant dense<0.000000e+00> : vector<46x128xf32>
    %37 = tpu.matmul %34, %36, %cst_31 {dimension_numbers = #tpu.dot_dimension_numbers<[1], [0], [0], [1], [0, 0, 1, 1], [], []>} : vector<46x128xbf16>, vector<128x128xbf16>, vector<46x128xf32> -> vector<46x128xf32>
    %c0_32 = arith.constant 0 : index
    %c0_33 = arith.constant 0 : index
    %38 = vector.load %arg14[%c0_32, %c0_33] : memref<48x128xf32, #tpu.memory_space<vmem>>, vector<46x128xf32>
    %39 = arith.truncf %38 : vector<46x128xf32> to vector<46x128xbf16>
    %c0_34 = arith.constant 0 : index
    %c0_35 = arith.constant 0 : index
    %c0_36 = arith.constant 0 : index
    %40 = vector.load %arg6[%c0_34, %c0_35, %c0_36] : memref<3x128x128xbf16, #tpu.memory_space<vmem>>, vector<1x128x128xbf16>
    %41 = vector.shape_cast %40 : vector<1x128x128xbf16> to vector<128x128xbf16>
    %cst_37 = arith.constant dense<0.000000e+00> : vector<46x128xf32>
    %42 = tpu.matmul %39, %41, %cst_37 {dimension_numbers = #tpu.dot_dimension_numbers<[1], [0], [0], [1], [0, 0, 1, 1], [], []>} : vector<46x128xbf16>, vector<128x128xbf16>, vector<46x128xf32> -> vector<46x128xf32>
    %43 = arith.addf %37, %42 : vector<46x128xf32>
    %c2_38 = arith.constant 2 : index
    %c0_39 = arith.constant 0 : index
    %44 = vector.load %arg14[%c2_38, %c0_39] : memref<48x128xf32, #tpu.memory_space<vmem>>, vector<46x128xf32>
    %45 = arith.truncf %44 : vector<46x128xf32> to vector<46x128xbf16>
    %c2_40 = arith.constant 2 : index
    %c0_41 = arith.constant 0 : index
    %c0_42 = arith.constant 0 : index
    %46 = vector.load %arg6[%c2_40, %c0_41, %c0_42] : memref<3x128x128xbf16, #tpu.memory_space<vmem>>, vector<1x128x128xbf16>
    %47 = vector.shape_cast %46 : vector<1x128x128xbf16> to vector<128x128xbf16>
    %cst_43 = arith.constant dense<0.000000e+00> : vector<46x128xf32>
    %48 = tpu.matmul %45, %47, %cst_43 {dimension_numbers = #tpu.dot_dimension_numbers<[1], [0], [0], [1], [0, 0, 1, 1], [], []>} : vector<46x128xbf16>, vector<128x128xbf16>, vector<46x128xf32> -> vector<46x128xf32>
    %49 = arith.addf %43, %48 : vector<46x128xf32>
    %c0_44 = arith.constant 0 : index
    %c0_45 = arith.constant 0 : index
    %50 = vector.load %arg7[%c0_44, %c0_45] : memref<1x128xf32, #tpu.memory_space<vmem>>, vector<1x128xf32>
    %51 = vector.broadcast %50 : vector<1x128xf32> to vector<46x128xf32>
    %52 = arith.addf %49, %51 : vector<46x128xf32>
    %53 = arith.addf %52, %8 : vector<46x128xf32>
    %54 = vector.broadcast %0 : vector<46x1xf32> to vector<46x128xf32>
    %55 = arith.mulf %53, %54 : vector<46x128xf32>
    %c1_46 = arith.constant 1 : index
    %c0_47 = arith.constant 0 : index
    %56 = vector.load %arg14[%c1_46, %c0_47] : memref<48x128xf32, #tpu.memory_space<vmem>>, vector<46x128xf32>
    tpu.vector_store %arg14[%c1_46, %c0_47], %55 {strides = array<i32>} : memref<48x128xf32, #tpu.memory_space<vmem>>, vector<46x128xf32>,
    %c1_48 = arith.constant 1 : index
    %c0_49 = arith.constant 0 : index
    %57 = vector.load %arg14[%c1_48, %c0_49] : memref<48x128xf32, #tpu.memory_space<vmem>>, vector<46x128xf32>
    %58 = arith.truncf %57 : vector<46x128xf32> to vector<46x128xbf16>
    %c0_50 = arith.constant 0 : index
    %c0_51 = arith.constant 0 : index
    %59 = vector.load %arg9[%c0_50, %c0_51] : memref<128x128xbf16, #tpu.memory_space<vmem>>, vector<128x128xbf16>
    %cst_52 = arith.constant dense<0.000000e+00> : vector<46x128xf32>
    %60 = tpu.matmul %58, %59, %cst_52 {dimension_numbers = #tpu.dot_dimension_numbers<[1], [0], [0], [1], [0, 0, 1, 1], [], []>} : vector<46x128xbf16>, vector<128x128xbf16>, vector<46x128xf32> -> vector<46x128xf32>
    %c0_53 = arith.constant 0 : index
    %c0_54 = arith.constant 0 : index
    %61 = vector.load %arg14[%c0_53, %c0_54] : memref<48x128xf32, #tpu.memory_space<vmem>>, vector<46x128xf32>
    %62 = arith.truncf %61 : vector<46x128xf32> to vector<46x128xbf16>
    %c0_55 = arith.constant 0 : index
    %c0_56 = arith.constant 0 : index
    %c0_57 = arith.constant 0 : index
    %63 = vector.load %arg8[%c0_55, %c0_56, %c0_57] : memref<2x128x128xbf16, #tpu.memory_space<vmem>>, vector<1x128x128xbf16>
    %64 = vector.shape_cast %63 : vector<1x128x128xbf16> to vector<128x128xbf16>
    %cst_58 = arith.constant dense<0.000000e+00> : vector<46x128xf32>
    %65 = tpu.matmul %62, %64, %cst_58 {dimension_numbers = #tpu.dot_dimension_numbers<[1], [0], [0], [1], [0, 0, 1, 1], [], []>} : vector<46x128xbf16>, vector<128x128xbf16>, vector<46x128xf32> -> vector<46x128xf32>
    %66 = arith.addf %60, %65 : vector<46x128xf32>
    %c2_59 = arith.constant 2 : index
    %c0_60 = arith.constant 0 : index
    %67 = vector.load %arg14[%c2_59, %c0_60] : memref<48x128xf32, #tpu.memory_space<vmem>>, vector<46x128xf32>
    %68 = arith.truncf %67 : vector<46x128xf32> to vector<46x128xbf16>
    %c1_61 = arith.constant 1 : index
    %c0_62 = arith.constant 0 : index
    %c0_63 = arith.constant 0 : index
    %69 = vector.load %arg8[%c1_61, %c0_62, %c0_63] : memref<2x128x128xbf16, #tpu.memory_space<vmem>>, vector<1x128x128xbf16>
    %70 = vector.shape_cast %69 : vector<1x128x128xbf16> to vector<128x128xbf16>
    %cst_64 = arith.constant dense<0.000000e+00> : vector<46x128xf32>
    %71 = tpu.matmul %68, %70, %cst_64 {dimension_numbers = #tpu.dot_dimension_numbers<[1], [0], [0], [1], [0, 0, 1, 1], [], []>} : vector<46x128xbf16>, vector<128x128xbf16>, vector<46x128xf32> -> vector<46x128xf32>
    %72 = arith.addf %66, %71 : vector<46x128xf32>
    %c0_65 = arith.constant 0 : index
    %c0_66 = arith.constant 0 : index
    %73 = vector.load %arg10[%c0_65, %c0_66] : memref<1x128xf32, #tpu.memory_space<vmem>>, vector<1x128xf32>
    %74 = vector.broadcast %73 : vector<1x128xf32> to vector<46x128xf32>
    %75 = arith.addf %72, %74 : vector<46x128xf32>
    %76 = arith.negf %75 : vector<46x128xf32>
    %77 = math.exp %76 : vector<46x128xf32>
    %cst_67 = arith.constant 1.000000e+00 : f32
    %78 = vector.broadcast %cst_67 : f32 to vector<46x128xf32>
    %79 = arith.addf %78, %77 : vector<46x128xf32>
    %80 = arith.divf %78, %79 : vector<46x128xf32>
    %81 = arith.mulf %75, %80 : vector<46x128xf32>
    %82 = vector.broadcast %0 : vector<46x1xf32> to vector<46x128xf32>
    %83 = arith.mulf %81, %82 : vector<46x128xf32>
    %c1_68 = arith.constant 1 : index
    %c0_69 = arith.constant 0 : index
    %84 = vector.load %arg14[%c1_68, %c0_69] : memref<48x128xf32, #tpu.memory_space<vmem>>, vector<46x128xf32>
    tpu.vector_store %arg14[%c1_68, %c0_69], %83 {strides = array<i32>} : memref<48x128xf32, #tpu.memory_space<vmem>>, vector<46x128xf32>,
    %c1_70 = arith.constant 1 : index
    %c0_71 = arith.constant 0 : index
    %85 = vector.load %arg14[%c1_70, %c0_71] : memref<48x128xf32, #tpu.memory_space<vmem>>, vector<46x128xf32>
    %86 = arith.truncf %85 : vector<46x128xf32> to vector<46x128xbf16>
    %c1_72 = arith.constant 1 : index
    %c0_73 = arith.constant 0 : index
    %c0_74 = arith.constant 0 : index
    %87 = vector.load %arg11[%c1_72, %c0_73, %c0_74] : memref<3x128x128xbf16, #tpu.memory_space<vmem>>, vector<1x128x128xbf16>
    %88 = vector.shape_cast %87 : vector<1x128x128xbf16> to vector<128x128xbf16>
    %cst_75 = arith.constant dense<0.000000e+00> : vector<46x128xf32>
    %89 = tpu.matmul %86, %88, %cst_75 {dimension_numbers = #tpu.dot_dimension_numbers<[1], [0], [0], [1], [0, 0, 1, 1], [], []>} : vector<46x128xbf16>, vector<128x128xbf16>, vector<46x128xf32> -> vector<46x128xf32>
    %c0_76 = arith.constant 0 : index
    %c0_77 = arith.constant 0 : index
    %90 = vector.load %arg14[%c0_76, %c0_77] : memref<48x128xf32, #tpu.memory_space<vmem>>, vector<46x128xf32>
    %91 = arith.truncf %90 : vector<46x128xf32> to vector<46x128xbf16>
    %c0_78 = arith.constant 0 : index
    %c0_79 = arith.constant 0 : index
    %c0_80 = arith.constant 0 : index
    %92 = vector.load %arg11[%c0_78, %c0_79, %c0_80] : memref<3x128x128xbf16, #tpu.memory_space<vmem>>, vector<1x128x128xbf16>
    %93 = vector.shape_cast %92 : vector<1x128x128xbf16> to vector<128x128xbf16>
    %cst_81 = arith.constant dense<0.000000e+00> : vector<46x128xf32>
    %94 = tpu.matmul %91, %93, %cst_81 {dimension_numbers = #tpu.dot_dimension_numbers<[1], [0], [0], [1], [0, 0, 1, 1], [], []>} : vector<46x128xbf16>, vector<128x128xbf16>, vector<46x128xf32> -> vector<46x128xf32>
    %95 = arith.addf %89, %94 : vector<46x128xf32>
    %c2_82 = arith.constant 2 : index
    %c0_83 = arith.constant 0 : index
    %96 = vector.load %arg14[%c2_82, %c0_83] : memref<48x128xf32, #tpu.memory_space<vmem>>, vector<46x128xf32>
    %97 = arith.truncf %96 : vector<46x128xf32> to vector<46x128xbf16>
    %c2_84 = arith.constant 2 : index
    %c0_85 = arith.constant 0 : index
    %c0_86 = arith.constant 0 : index
    %98 = vector.load %arg11[%c2_84, %c0_85, %c0_86] : memref<3x128x128xbf16, #tpu.memory_space<vmem>>, vector<1x128x128xbf16>
    %99 = vector.shape_cast %98 : vector<1x128x128xbf16> to vector<128x128xbf16>
    %cst_87 = arith.constant dense<0.000000e+00> : vector<46x128xf32>
    %100 = tpu.matmul %97, %99, %cst_87 {dimension_numbers = #tpu.dot_dimension_numbers<[1], [0], [0], [1], [0, 0, 1, 1], [], []>} : vector<46x128xbf16>, vector<128x128xbf16>, vector<46x128xf32> -> vector<46x128xf32>
    %101 = arith.addf %95, %100 : vector<46x128xf32>
    %c0_88 = arith.constant 0 : index
    %c0_89 = arith.constant 0 : index
    %102 = vector.load %arg12[%c0_88, %c0_89] : memref<1x128xf32, #tpu.memory_space<vmem>>, vector<1x128xf32>
    %103 = vector.broadcast %102 : vector<1x128xf32> to vector<46x128xf32>
    %104 = arith.addf %101, %103 : vector<46x128xf32>
    %105 = arith.addf %104, %55 : vector<46x128xf32>
    %106 = vector.broadcast %0 : vector<46x1xf32> to vector<46x128xf32>
    %107 = arith.mulf %105, %106 : vector<46x128xf32>
    %c0_90 = arith.constant 0 : index
    %c1_91 = arith.constant 1 : index
    %c0_92 = arith.constant 0 : index
    %108 = vector.load %arg13[%c0_90, %c1_91, %c0_92] : memref<1x48x128xf32, #tpu.memory_space<vmem>>, vector<1x46x128xf32>
    %109 = vector.shape_cast %108 : vector<1x46x128xf32> to vector<46x128xf32>
    %110 = vector.shape_cast %107 : vector<46x128xf32> to vector<1x46x128xf32>
    tpu.vector_store %arg13[%c0_90, %c1_91, %c0_92], %110 {strides = array<i32>} : memref<1x48x128xf32, #tpu.memory_space<vmem>>, vector<1x46x128xf32>,
    %cst_93 = arith.constant 0.000000e+00 : f32
    %111 = vector.broadcast %cst_93 : f32 to vector<1x128xf32>
    %c0_94 = arith.constant 0 : index
    %c0_95 = arith.constant 0 : index
    %c0_96 = arith.constant 0 : index
    %112 = vector.load %arg13[%c0_94, %c0_95, %c0_96] : memref<1x48x128xf32, #tpu.memory_space<vmem>>, vector<1x1x128xf32>
    %113 = vector.shape_cast %112 : vector<1x1x128xf32> to vector<1x128xf32>
    %114 = vector.shape_cast %111 : vector<1x128xf32> to vector<1x1x128xf32>
    tpu.vector_store %arg13[%c0_94, %c0_95, %c0_96], %114 {strides = array<i32>} : memref<1x48x128xf32, #tpu.memory_space<vmem>>, vector<1x1x128xf32>,
    %c0_97 = arith.constant 0 : index
    %c47 = arith.constant 47 : index
    %c0_98 = arith.constant 0 : index
    %115 = vector.load %arg13[%c0_97, %c47, %c0_98] : memref<1x48x128xf32, #tpu.memory_space<vmem>>, vector<1x1x128xf32>
    %116 = vector.shape_cast %115 : vector<1x1x128xf32> to vector<1x128xf32>
    %117 = vector.shape_cast %111 : vector<1x128xf32> to vector<1x1x128xf32>
    tpu.vector_store %arg13[%c0_97, %c47, %c0_98], %117 {strides = array<i32>} : memref<1x48x128xf32, #tpu.memory_space<vmem>>, vector<1x1x128xf32>,
    return
  }
  func.func @transform_0(%arg0: i32) -> (i32, i32, i32) {
    %c0_i32 = arith.constant 0 : i32
    %c0_i32_0 = arith.constant 0 : i32
    %c0_i32_1 = arith.constant 0 : i32
    return %arg0, %c0_i32, %c0_i32_0 : i32, i32, i32
  }
  func.func @transform_1(%arg0: i32) -> (i32, i32) {
    %c0_i32 = arith.constant 0 : i32
    %c0_i32_0 = arith.constant 0 : i32
    %c0_i32_1 = arith.constant 0 : i32
    return %c0_i32, %c0_i32_0 : i32, i32
  }
  func.func @transform_2(%arg0: i32) -> (i32, i32, i32) {
    %c0_i32 = arith.constant 0 : i32
    %c0_i32_0 = arith.constant 0 : i32
    %c0_i32_1 = arith.constant 0 : i32
    %c0_i32_2 = arith.constant 0 : i32
    return %c0_i32, %c0_i32_0, %c0_i32_1 : i32, i32, i32
  }
  func.func @transform_3(%arg0: i32) -> (i32, i32) {
    %c0_i32 = arith.constant 0 : i32
    %c0_i32_0 = arith.constant 0 : i32
    %c0_i32_1 = arith.constant 0 : i32
    return %c0_i32, %c0_i32_0 : i32, i32
  }
  func.func @transform_4(%arg0: i32) -> (i32, i32) {
    %c0_i32 = arith.constant 0 : i32
    %c0_i32_0 = arith.constant 0 : i32
    %c0_i32_1 = arith.constant 0 : i32
    return %c0_i32, %c0_i32_0 : i32, i32
  }
  func.func @transform_5(%arg0: i32) -> (i32, i32, i32) {
    %c0_i32 = arith.constant 0 : i32
    %c0_i32_0 = arith.constant 0 : i32
    %c0_i32_1 = arith.constant 0 : i32
    %c0_i32_2 = arith.constant 0 : i32
    return %c0_i32, %c0_i32_0, %c0_i32_1 : i32, i32, i32
  }
  func.func @transform_6(%arg0: i32) -> (i32, i32) {
    %c0_i32 = arith.constant 0 : i32
    %c0_i32_0 = arith.constant 0 : i32
    %c0_i32_1 = arith.constant 0 : i32
    return %c0_i32, %c0_i32_0 : i32, i32
  }
  func.func @transform_7(%arg0: i32) -> (i32, i32, i32) {
    %c0_i32 = arith.constant 0 : i32
    %c0_i32_0 = arith.constant 0 : i32
    %c0_i32_1 = arith.constant 0 : i32
    %c0_i32_2 = arith.constant 0 : i32
    return %c0_i32, %c0_i32_0, %c0_i32_1 : i32, i32, i32
  }
  func.func @transform_8(%arg0: i32) -> (i32, i32) {
    %c0_i32 = arith.constant 0 : i32
    %c0_i32_0 = arith.constant 0 : i32
    %c0_i32_1 = arith.constant 0 : i32
    return %c0_i32, %c0_i32_0 : i32, i32
  }
  func.func @transform_9(%arg0: i32) -> (i32, i32) {
    %c0_i32 = arith.constant 0 : i32
    %c0_i32_0 = arith.constant 0 : i32
    %c0_i32_1 = arith.constant 0 : i32
    return %c0_i32, %c0_i32_0 : i32, i32
  }
  func.func @transform_10(%arg0: i32) -> (i32, i32, i32) {
    %c0_i32 = arith.constant 0 : i32
    %c0_i32_0 = arith.constant 0 : i32
    %c0_i32_1 = arith.constant 0 : i32
    %c0_i32_2 = arith.constant 0 : i32
    return %c0_i32, %c0_i32_0, %c0_i32_1 : i32, i32, i32
  }
  func.func @transform_11(%arg0: i32) -> (i32, i32) {
    %c0_i32 = arith.constant 0 : i32
    %c0_i32_0 = arith.constant 0 : i32
    %c0_i32_1 = arith.constant 0 : i32
    return %c0_i32, %c0_i32_0 : i32, i32
  }
  func.func @transform_12(%arg0: i32) -> (i32, i32, i32) {
    %c0_i32 = arith.constant 0 : i32
    %c0_i32_0 = arith.constant 0 : i32
    %c0_i32_1 = arith.constant 0 : i32
    return %arg0, %c0_i32, %c0_i32_0 : i32, i32, i32
  }
}

</mosaic_0001>

<bundles_post_ra>
// kernel: residual_layer_forward.1
= control target key start
LH: loop header
LB: loop body
LE: loop exit
PB: predicated region body
PF: predicated region fallthrough
CT: control target
= control target key end

     0   :  { %17 = vsyncpa [#allocation4], 0  ;;  %s3000_s0 = inlined_call_operand.vmem [shape: bf16[1,48,64], index: 0, kind: input, shape index: {}]   ;;  %s3001_s1 = inlined_call_operand.vmem [shape: f32[46,1], index: 1, kind: input, shape index: {}]   ;;  %s3002_s2 = inlined_call_operand.vmem [shape: bf16[2,64,128], index: 2, kind: input, shape index: {}]   ;;  %s3003_s3 = inlined_call_operand.hbm [shape: bf16[64,256], index: 3, kind: input, shape index: {}]   ;;  %s3004_s4 = inlined_call_operand.vmem [shape: f32[1,128], index: 4, kind: input, shape index: {}]   ;;  %s3005_s5 = inlined_call_operand.vmem [shape: bf16[3,128,128], index: 5, kind: input, shape index: {}]   ;;  %s3006_s6 = inlined_call_operand.vmem [shape: f32[1,128], index: 6, kind: input, shape index: {}]   ;;  %s3007_s7 = inlined_call_operand.vmem [shape: bf16[2,128,128], index: 7, kind: input, shape index: {}]   ;;  %s3008_s8 = inlined_call_operand.hbm [shape: bf16[128,128], index: 8, kind: input, shape index: {}]   ;;  %s3009_s9 = inlined_call_operand.hbm [shape: f32[1,128], index: 9, kind: input, shape index: {}]   ;;  %s3010_s10 = inlined_call_operand.vmem [shape: bf16[3,128,128], index: 10, kind: input, shape index: {}]   ;;  %s3011_s11 = inlined_call_operand.vmem [shape: f32[1,128], index: 11, kind: input, shape index: {}]   ;;  %s3012_s12 = inlined_call_operand.vmem [shape: f32[1,48,128], index: 12, kind: output, shape index: {}]  }
   0x1   :  { %18 = vsyncpa [#allocation6], 0  ;;  %s50_s23 = sshll.u32 %s3008_s8, 4  ;;  %s2405_s24 = smov [#allocation5]   ;;  %s51_s23 = int_to_ptr.hbm [resolvable:$true] %s50_s23 }
   0x2   :  { %s52_s25 = sshll.u32 %s2405_s24, 4  ;;  %s29_s28 = sshll.u32 %s3003_s3, 4  ;;  %s53_s25 = int_to_ptr.vmem [resolvable:$true] %s52_s25  ;;  %s30_s28 = int_to_ptr.hbm [resolvable:$true] %s29_s28 }
   0x3   :  { %s2406_s29 = smov 64   ;;  %s2407_s30 = smov 4  }
   0x4   :  { %58 = dma.hbm_to_vmem [thread:$0]  %s51_s23, 1024, %s53_s25, [#allocation6], %s2406_s29, %s2406_s29, %s2407_s30  }
   0x5   :  { %s2408_s13 = smov [#allocation3]   ;;  %s2409_s15 = smov 128  }
   0x6   :  { %s31_s14 = sshll.u32 %s2408_s13, 4  ;;  %s2410_s16 = smov 8   ;;  %s32_s14 = int_to_ptr.vmem [resolvable:$true] %s31_s14 }
   0x7   :  { %37 = dma.hbm_to_vmem [thread:$0]  %s30_s28, 1024, %s32_s14, [#allocation4], %s2409_s15, %s2409_s15, %s2410_s16  }
   0x8   :  { %s64_s18 = sshll.u32 %s3009_s9, 4  ;;  %s2411_s19 = smov [#allocation7]   ;;  %s65_s18 = int_to_ptr.hbm [resolvable:$true] %s64_s18 }
   0x9   :  { %s66_s20 = sshll.u32 %s2411_s19, 4  ;;  %s67_s20 = int_to_ptr.vmem [resolvable:$true] %s66_s20 }
   0xa   :  { %69 = dma.hbm_to_vmem [thread:$0]  %s65_s18, 16, %s67_s20, [#allocation6]  }
   0xb   :  { %2401 = dma.done.wait [#allocation4], 1024  }
   0xc   :  { %2402 = vsyncadd [#allocation4], 4294966272 }
   0xd   :  { %2403 = dma.done.wait [#allocation6], 1040  }
   0xe   :  { %2404 = vsyncadd [#allocation6], 4294966256  ;;  %v1709_v0 = vld [vmem:[#allocation3 + $0x30] sm:$0xf]  ;;  %v2155_v1 = vld [vmem:[#allocation3 + $0x34] sm:$0xf0] }
   0xf   :  { %v2159_v2 = vld [vmem:[%s3002_s2 + $0x18] sm:$0xff]  ;;  %v1710_v3 = vor.u32 %v2155_v1, %v1709_v0  ;;  %v1701_v5 = vld [vmem:[#allocation3 + $0x20] sm:$0xf]  ;;  %v1693_v10 = vld [vmem:[#allocation3 + $0x10] sm:$0xf]  ;;  %vm336_vm1 = vcmask 1046528  }
  0x10   :  { %v2163_v4 = vld [vmem:[%s3002_s2 + $0x38] sm:$0xff]  ;;  %297 = vmatpush.bf16.msra.mxu2 %v2159_v2  ;;  %v2158_v7 = vld [vmem:[%s3002_s2 + $0x10] sm:$0xff]  ;;  %v2151_v11 = vld [vmem:[#allocation3 + $0x14] sm:$0xf0]  ;;  %vm128_vm0 = vsmask.f32 7424 }
  0x11   :  { %v2153_v6 = vld [vmem:[#allocation3 + $0x24] sm:$0xf0]  ;;  %206 = vmatpush.bf16.msra.mxu0 %v1710_v3  ;;  %379 = vmatpush.bf16.msra.mxu3 %v2163_v4  ;;  %v2162_v9 = vld [vmem:[%s3002_s2 + $0x30] sm:$0xff]  ;;  %v2237_v13 = vld [vmem:[%s3000_s0] sm:$0xff]   ;;  %v1694_v19 = vor.u32 %v2151_v11, %v1693_v10  ;;  %vm192_vm2 = vcmask 523264   ;;  %v2412_v42 = vmov 0  }
  0x12   :  { %v1702_v8 = vor.u32 %v2153_v6, %v1701_v5  ;;  %2253 = vmatpush.bf16.msra.mxu1 %v1710_v3  ;;  %v1685_v12 = vld [vmem:[#allocation3] sm:$0xf]  ;;  %v2506_v14 = vld [vmem:[%s3000_s0 + $0x8] sm:$0xff]  ;;  %v132_v16 = vshll.u32 %v2237_v13, 16  ;;  %v2249_v17 = vld [vmem:[%s3000_s0] sm:$0xf0]  ;;  %2274 = vset.pattern.permute.xlu0 %v2412_v42 }
  0x13   :  { %v2157_v15 = vld [vmem:[%s3002_s2 + $0x8] sm:$0xff]  ;;  %v2250_v18 = vld [vmem:[%s3000_s0] sm:$0xe]  ;;  %v2149_v21 = vld [vmem:[#allocation3 + $0x4] sm:$0xf0]  ;;  %v130_v22 = vshrl.u32 %v2237_v13, 16  ;;  %2275 = vset.pattern.permute.xlu1 %v2412_v42  ;;  %2276 = vset.pattern.permute.xlu2 %v2412_v42 }
  0x14   :  { %298 = vmatpush.bf16.msra.mxu2 %v2158_v7  ;;  %v2161_v20 = vld [vmem:[%s3002_s2 + $0x28] sm:$0xff]  ;;  %v137_v23 = vshll.u32 %v2506_v14, 16  ;;  %v2251_v24 = vor.u32 %v2250_v18, %v2249_v17  ;;  %v2244_v25 = vld [vmem:[%s3000_s0 + $0x10] sm:$0xff]   ;;  %v134_v26 = vrot.slane %v132_v16, 1  ;;  %v1686_v28 = vor.u32 %v2149_v21, %v1685_v12  ;;  %v2156_v29 = vld [vmem:[%s3002_s2] sm:$0xff] }
  0x15   :  { %207 = vmatpush.bf16.msra.mxu0 %v1702_v8  ;;  %380 = vmatpush.bf16.msra.mxu3 %v2162_v9  ;;  %v145_v27 = vshll.u32 %v2244_v25, 16  ;;  %v338_v30 = vrot.slane %v2506_v14, 1  ;;  %v2160_v31 = vld [vmem:[%s3002_s2 + $0x20] sm:$0xff]  ;;  %v149_v35 = vshrl.u32 %v2244_v25, 16  ;;  %v89_v41 = vld [vmem:[%s3001_s1 + $0x10] sm:$0xff]  ;;  %v141_v44 = vshrl.u32 %v2506_v14, 16 }
  0x16   :  { %2254 = vmatpush.bf16.msra.mxu1 %v1702_v8  ;;  %v135_v32 = vor.u32 %v134_v26, %v130_v22  ;;  %v139_v33 = vrot.slane %v137_v23, 1  ;;  %v337_v34 = vrot.slane %v2251_v24, 1  ;;  %v87_v40 = vld [vmem:[%s3001_s1] sm:$0xff]  ;;  %547 = vperm.xlu1 %2275, %v89_v41   ;;  %v88_v45 = vld [vmem:[%s3001_s1 + $0x8] sm:$0xff]  ;;  %v90_v46 = vld [vmem:[%s3001_s1 + $0x18] sm:$0xff]  ;;  %v340_v48 = vrot.slane %v2244_v25, 1 }
  0x17   :  { %v147_v36 = vrot.slane %v145_v27, 1  ;;  %v91_v43 = vld [vmem:[%s3001_s1 + $0x20] sm:$0xff]  ;;  %537 = vperm.xlu0 %2274, %v87_v40   ;;  %v92_v49 = vld [vmem:[%s3001_s1 + $0x28] sm:$0x3f]  ;;  %v2247_v52 = vld [vmem:[%s3000_s0 + $0x10] sm:$0xf]  }
  0x18   :  { %299 = vmatpush.bf16.msra.mxu2 %v2157_v15  ;;  %v140_v37 = vsel %vm128_vm0, %v135_v32, %v139_v33  ;;  %v339_v38 = vsel %vm336_vm1, %v337_v34, %v338_v30  ;;  %557 = vperm.xlu2 %2276, %v91_v43   ;;  %v143_v47 = vor.u32 %v141_v44, %v139_v33  ;;  %v2252_v53 = vld [vmem:[%s3000_s0 + $0x10] sm:$0x70]  ;;  %v2154_v55 = vld [vmem:[#allocation3 + $0x34] sm:$0xf]  ;;  %v1711_v56 = vld [vmem:[#allocation3 + $0x38] sm:$0xf0] }
  0x19   :  { %208 = vmatpush.bf16.msra.mxu0 %v1694_v19  ;;  %381 = vmatpush.bf16.msra.mxu3 %v2161_v20  ;;  %v2533_v39 = vor.u32 %v149_v35, %v147_v36  ;;  %v341_v51 = vsel %vm336_vm1, %v338_v30, %v340_v48  ;;  %v2248_v54 = vor.u32 %v2252_v53, %v2247_v52  ;;  %v2152_v58 = vld [vmem:[#allocation3 + $0x24] sm:$0xf]  ;;  %v1703_v59 = vld [vmem:[#allocation3 + $0x28] sm:$0xf0]  ;;  %v2150_v61 = vld [vmem:[#allocation3 + $0x14] sm:$0xf] }
  0x1a   :  { %2255 = vmatpush.bf16.msra.mxu1 %v1694_v19  ;;  %v148_v50 = vsel %vm128_vm0, %v143_v47, %v147_v36  ;;  %v1714_v57 = vor.u32 %v2154_v55, %v1711_v56  ;;  %v1706_v60 = vor.u32 %v2152_v58, %v1703_v59  ;;  %v1695_v62 = vld [vmem:[#allocation3 + $0x18] sm:$0xf0]  ;;  %v2148_v0 = vld [vmem:[#allocation3 + $0x4] sm:$0xf]  ;;  %v1687_v1 = vld [vmem:[#allocation3 + $0x8] sm:$0xf0] }
  0x1b   :  { %v1698_v63 = vor.u32 %v2150_v61, %v1695_v62  ;;  %v1690_v2 = vor.u32 %v2148_v0, %v1687_v1  ;;  %v2171_v3 = vld [vmem:[%s3005_s5 + $0x78] sm:$0xff]  ;;  %v2170_v4 = vld [vmem:[%s3005_s5 + $0x70] sm:$0xff]  ;;  %v2169_v6 = vld [vmem:[%s3005_s5 + $0x68] sm:$0xff]  ;;  %v2413_v24 = vmov 0.0  }
  0x1c   :  { %300 = vmatpush.bf16.msra.mxu2 %v2156_v29  ;;  %v2179_v5 = vld [vmem:[%s3005_s5 + $0x38] sm:$0xff]  ;;  %v2178_v8 = vld [vmem:[%s3005_s5 + $0x30] sm:$0xff]  ;;  %v2168_v9 = vld [vmem:[%s3005_s5 + $0x60] sm:$0xff]  ;;  %93 = vst [vmem:[#allocation2] sm:$0xff] %v2413_v24 }
  0x1d   :  { %209 = vmatpush.bf16.msra.mxu0 %v1686_v28  ;;  %382 = vmatpush.bf16.msra.mxu3 %v2160_v31  ;;  %v2177_v15 = vld [vmem:[%s3005_s5 + $0x28] sm:$0xff]  ;;  %v2167_v18 = vld [vmem:[%s3005_s5 + $0x58] sm:$0xff]  ;;  %v2186_v20 = vld [vmem:[%s3005_s5 + $0xb0] sm:$0xff]  ;;  %94 = vst [vmem:[#allocation2 + $0x8] sm:$0xff] %v2413_v24 }
  0x1e   :  { %2256 = vmatpush.bf16.msra.mxu1 %v1686_v28  ;;  %552 = vperm.xlu1 %2275, %v90_v46   ;;  %v2176_v21 = vld [vmem:[%s3005_s5 + $0x20] sm:$0xff]  ;;  %v2166_v25 = vld [vmem:[%s3005_s5 + $0x50] sm:$0xff]  ;;  %v2185_v28 = vld [vmem:[%s3005_s5 + $0xa8] sm:$0xff]  ;;  %1671 = vst [vmem:[%s3012_s12] sm:$0x1] %v2413_v24 }
  0x1f   :  { %1737 = vmatmul.msk.bf16.vlgmr.msra.gmra.mxu2 %vm192_vm2, %v2237_v13  ;;  %542 = vperm.xlu0 %2274, %v88_v45   ;;  %v2596_v13 = vld [vmem:[%s3004_s4] ss:$0 sm:$0xff]  ;;  %1672 = vst [vmem:[%s3012_s12 + $0x2f] sm:$0x1] %v2413_v24  ;;  %v2175_v30 = vld [vmem:[%s3005_s5 + $0x18] sm:$0xff]  ;;  %v2165_v31 = vld [vmem:[%s3005_s5 + $0x48] sm:$0xff] }
  0x20   :  { %1715 = vmatmul.msk.bf16.vlgmr.msra.gmra.mxu0 %vm192_vm2, %v140_v37  ;;  %1764 = vmatmul.msk.bf16.vlgmr.msra.gmra.mxu3 %vm192_vm2, %v339_v38  ;;  %95 = vst [vmem:[#allocation2 + $0x10] sm:$0xff] %v2413_v24  ;;  %v2184_v34 = vld [vmem:[%s3005_s5 + $0xa0] sm:$0xff]  ;;  %v2183_v44 = vld [vmem:[%s3005_s5 + $0x98] sm:$0xff]  ;;  %v2173_v45 = vld [vmem:[%s3005_s5 + $0x8] sm:$0xff] }
  0x21   :  { %1717 = vmatmul.msk.bf16.vlgmr.msra.gmra.mxu1 %vm192_vm2, %v2533_v39  ;;  %562 = vperm.xlu2 %2276, %v92_v49   ;;  %96 = vst [vmem:[#allocation2 + $0x18] sm:$0xff] %v2413_v24  ;;  %v2164_v40 = vld [vmem:[%s3005_s5 + $0x40] sm:$0xff]  ;;  %v2182_v53 = vld [vmem:[%s3005_s5 + $0x90] sm:$0xff]  ;;  %v2181_v61 = vld [vmem:[%s3005_s5 + $0x88] sm:$0xff] }
  0x22   :  { %230 = vmatpush.bf16.msrb.mxu1 %v1714_v57  ;;  %676 = vmatpush.bf16.msrb.mxu0 %v2179_v5  ;;  %97 = vst [vmem:[#allocation2 + $0x20] sm:$0xff] %v2413_v24 }
  0x23   :  { %98 = vst [vmem:[#allocation2 + $0x28] sm:$0xff] %v2413_v24 }
  0x26   :  { %231 = vmatpush.bf16.msrb.mxu1 %v1706_v60  ;;  %677 = vmatpush.bf16.msrb.mxu0 %v2178_v8 }
  0x2a   :  { %232 = vmatpush.bf16.msrb.mxu1 %v1698_v63  ;;  %678 = vmatpush.bf16.msrb.mxu0 %v2177_v15 }
  0x2e   :  { %233 = vmatpush.bf16.msrb.mxu1 %v1690_v2  ;;  %679 = vmatpush.bf16.msrb.mxu0 %v2176_v21 }
  0x2f   :  { %1738 = vmatmul.msk.bf16.gmra.mxu2 %vm192_vm2, %v2506_v14  ;;  %v2187_v14 = vld [vmem:[%s3005_s5 + $0xb8] sm:$0xff] }
  0x30   :  { %1716 = vmatmul.msk.bf16.gmra.mxu0 %vm192_vm2, %v148_v50  ;;  %1765 = vmatmul.msk.bf16.gmra.mxu3 %vm192_vm2, %v341_v51 }
  0x31   :  { %1718 = vmatmul.msk.bf16.vlgmr.msrb.gmra.mxu1 %vm192_vm2, %v140_v37  ;;  %846 = vmatpush.bf16.msrb.mxu2 %v2187_v14 }
  0x32   :  { %748 = vmatpush.bf16.msra.mxu1 %v2171_v3  ;;  %680 = vmatpush.bf16.msrb.mxu0 %v2175_v30 }
  0x35   :  { %847 = vmatpush.bf16.msrb.mxu2 %v2186_v20 }
  0x36   :  { %749 = vmatpush.bf16.msra.mxu1 %v2170_v4 }
  0x39   :  { %848 = vmatpush.bf16.msrb.mxu2 %v2185_v28 }
  0x3a   :  { %750 = vmatpush.bf16.msra.mxu1 %v2169_v6 }
  0x3d   :  { %849 = vmatpush.bf16.msrb.mxu2 %v2184_v34 }
  0x3e   :  { %751 = vmatpush.bf16.msra.mxu1 %v2168_v9  ;;  %v2180_v9 = vld [vmem:[%s3005_s5 + $0x80] sm:$0xff] }
  0x3f   :  { %1739 = vmatmul.msk.bf16.gmra.mxu2 %vm192_vm2, %v2248_v54  ;;  %v2172_v54 = vld [vmem:[%s3005_s5] sm:$0xff] }
  0x40   :  { %1766 = vmatmul.msk.bf16.gmra.mxu3 %vm192_vm2, %v340_v48 }
  0x41   :  { %1719 = vmatmul.msk.bf16.gmra.mxu1 %vm192_vm2, %v148_v50  ;;  %850 = vmatpush.bf16.msrb.mxu2 %v2183_v44 }
  0x42   :  { %752 = vmatpush.bf16.msra.mxu1 %v2167_v18 }
  0x45   :  { %851 = vmatpush.bf16.msrb.mxu2 %v2182_v53 }
  0x46   :  { %753 = vmatpush.bf16.msra.mxu1 %v2166_v25 }
  0x49   :  { %852 = vmatpush.bf16.msrb.mxu2 %v2181_v61 }
  0x4a   :  { %754 = vmatpush.bf16.msra.mxu1 %v2165_v31 }
  0x4d   :  { %853 = vmatpush.bf16.msrb.mxu2 %v2180_v9 }
  0x4e   :  { %755 = vmatpush.bf16.msra.mxu1 %v2164_v40 }
  0x51   :  { %1720 = vmatmul.msk.bf16.gmra.mxu1 %vm192_vm2, %v2533_v39  ;;  %v2174_v39 = vld [vmem:[%s3005_s5 + $0x10] sm:$0xff] }
  0x52   :  { %681 = vmatpush.bf16.msrb.mxu0 %v2174_v39 }
  0x56   :  { %682 = vmatpush.bf16.msrb.mxu0 %v2173_v45 }
  0x5a   :  { %683 = vmatpush.bf16.msrb.mxu0 %v2172_v54 }
  0x89   :  { %v2673_v8 = vpop.permute.xlu0 %537 }
  0x9d   :  { %v211_v7 = vpop.f32.mrf.mxu0 }
  0xa2   :  { %v302_v10 = vpop.f32.mrf.mxu2 }
  0xa3   :  { %v317_v11 = vadd.f32 %v302_v10, %v211_v7  ;;  %v384_v12 = vpop.f32.mrf.mxu3 }
  0xa5   :  { %v399_v16 = vadd.f32 %v384_v12, %v317_v11  ;;  %v213_v17 = vpop.f32.mrf.mxu0  ;;  %v221_v12 = vpop.f32.mrf.mxu1 }
  0xa7   :  { %v2610_v19 = vadd.f32 %v2596_v13, %v399_v16 }
  0xa9   :  { %v1767_v22 = vmul.f32 -1.442695, %v2610_v19 }
  0xaa   :  { %v304_v23 = vpop.f32.mrf.mxu2 }
  0xab   :  { %2281 = vpow2.f32 %v1767_v22  ;;  %v318_v26 = vadd.f32 %v304_v23, %v213_v17  ;;  %v386_v27 = vpop.f32.mrf.mxu3 }
  0xad   :  { %v400_v29 = vadd.f32 %v386_v27, %v318_v26  ;;  %v216_v33 = vpop.f32.mrf.mxu0  ;;  %v223_v39 = vpop.f32.mrf.mxu1 }
  0xaf   :  { %v2638_v32 = vadd.f32 %v2596_v13, %v400_v29 }
  0xb1   :  { %v2282_v35 = vpop.eup %2281  ;;  %v1768_v36 = vmul.f32 -1.442695, %v2638_v32 }
  0xb2   :  { %v433_v37 = vadd.f32 1.0, %v2282_v35  ;;  %v307_v38 = vpop.f32.mrf.mxu2 }
  0xb3   :  { %2283 = vpow2.f32 %v1768_v36  ;;  %v319_v41 = vadd.f32 %v307_v38, %v216_v33  ;;  %v389_v42 = vpop.f32.mrf.mxu3  ;;  %v2684_v36 = vpop.permute.xlu0 %542 }
  0xb4   :  { %2285 = vrcp.f32 %v433_v37  ;;  %v450_v60 = vand.u32 2147483648, %v433_v37  ;;  %v448_v63 = vand.u32 2147483647, %v433_v37  ;;  %vm444_vm4 = vweird.f32 %v433_v37 }
  0xb5   :  { %v401_v43 = vadd.f32 %v389_v42, %v319_v41  ;;  %v218_v51 = vpop.f32.mrf.mxu0 }
  0xb6   :  { %v451_v5 = vor.u32 1.1754944e-38, %v450_v60  ;;  %vm449_vm6 = vcmp.eq.f32.partialorder %v448_v63, 8.507059e+37 }
  0xb7   :  { %v2657_v46 = vadd.f32 %v2596_v13, %v401_v43 }
  0xb9   :  { %v2284_v47 = vpop.eup %2283  ;;  %v1769_v48 = vmul.f32 -1.442695, %v2657_v46 }
  0xba   :  { %v2286_v49 = vpop.eup %2285  ;;  %v434_v50 = vadd.f32 1.0, %v2284_v47  ;;  %v309_v52 = vpop.f32.mrf.mxu2 }
  0xbb   :  { %v440_v55 = vmul.f32 %v2286_v49, %v433_v37  ;;  %2287 = vpow2.f32 %v1769_v48  ;;  %v320_v56 = vadd.f32 %v309_v52, %v218_v51  ;;  %v391_v57 = vpop.f32.mrf.mxu3  ;;  %vm445_vm3 = vweird.f32 %v2286_v49 }
  0xbc   :  { %2289 = vrcp.f32 %v434_v50  ;;  %vm446_vm5 = vmor %vm444_vm4, %vm445_vm3  ;;  %v463_v20 = vand.u32 2147483647, %v434_v50  ;;  %v465_v21 = vand.u32 2147483648, %v434_v50  ;;  %vm459_vm8 = vweird.f32 %v434_v50 }
  0xbd   :  { %v441_v58 = vsub.f32 1.0, %v440_v55  ;;  %v402_v59 = vadd.f32 %v391_v57, %v320_v56 }
  0xbe   :  { %vm464_vm10 = vcmp.eq.f32.partialorder %v463_v20, 8.507059e+37 }
  0xbf   :  { %v442_v62 = vmul.f32 %v2286_v49, %v441_v58  ;;  %v2670_v0 = vadd.f32 %v2596_v13, %v402_v59  ;;  %v2692_v58 = vpop.permute.xlu1 %547 }
  0xc1   :  { %v2288_v1 = vpop.eup %2287  ;;  %v443_v2 = vadd.f32 %v2286_v49, %v442_v62  ;;  %v1770_v3 = vmul.f32 -1.442695, %v2670_v0 }
  0xc2   :  { %v2290_v4 = vpop.eup %2289  ;;  %v435_v6 = vadd.f32 1.0, %v2288_v1  ;;  %v312_v7 = vpop.f32.mrf.mxu2 }
  0xc3   :  { %v447_v10 = vsel %vm446_vm5, %v2286_v49, %v443_v2  ;;  %v455_v11 = vmul.f32 %v2290_v4, %v434_v50  ;;  %2291 = vpow2.f32 %v1770_v3  ;;  %v321_v17 = vadd.f32 %v312_v7, %v221_v12  ;;  %v394_v18 = vpop.f32.mrf.mxu3 }
  0xc4   :  { %v452_v14 = vsel %vm449_vm6, %v451_v5, %v447_v10  ;;  %2293 = vrcp.f32 %v435_v6  ;;  %vm460_vm7 = vweird.f32 %v2290_v4  ;;  %v480_v40 = vand.u32 2147483648, %v435_v6 }
  0xc5   :  { %v529_v15 = vmul.f32 %v452_v14, %v2610_v19  ;;  %v456_v16 = vsub.f32 1.0, %v455_v11  ;;  %v403_v23 = vadd.f32 %v394_v18, %v321_v17  ;;  %vm461_vm9 = vmor %vm459_vm8, %vm460_vm7  ;;  %v466_v19 = vor.u32 1.1754944e-38, %v465_v21 }
  0xc6   :  { %v478_v43 = vand.u32 2147483647, %v435_v6  ;;  %vm474_vm12 = vweird.f32 %v435_v6  ;;  %v481_v51 = vor.u32 1.1754944e-38, %v480_v40 }
  0xc7   :  { %v457_v22 = vmul.f32 %v2290_v4, %v456_v16  ;;  %v565_v24 = vmul.f32 %v2673_v8, %v529_v15  ;;  %v2681_v27 = vadd.f32 %v2596_v13, %v403_v23  ;;  %v2697_v14 = vpop.permute.xlu1 %552 }
  0xc8   :  { %vm479_vm14 = vcmp.eq.f32.partialorder %v478_v43, 8.507059e+37 }
  0xc9   :  { %v2292_v25 = vpop.eup %2291  ;;  %v458_v26 = vadd.f32 %v2290_v4, %v457_v22  ;;  %571 = vst [vmem:[#allocation2 + $0x1] sm:$0xff] %v565_v24  ;;  %v1771_v33 = vmul.f32 -1.442695, %v2681_v27 }
  0xca   :  { %v2294_v28 = vpop.eup %2293  ;;  %v436_v29 = vadd.f32 1.0, %v2292_v25  ;;  %v314_v34 = vpop.f32.mrf.mxu2 }
  0xcb   :  { %v462_v30 = vsel %vm461_vm9, %v2290_v4, %v458_v26  ;;  %v470_v31 = vmul.f32 %v2294_v28, %v435_v6  ;;  %v322_v41 = vadd.f32 %v314_v34, %v223_v39  ;;  %vm475_vm11 = vweird.f32 %v2294_v28  ;;  %v396_v44 = vpop.f32.mrf.mxu3 }
  0xcc   :  { %v467_v35 = vsel %vm464_vm10, %v466_v19, %v462_v30  ;;  %2295 = vrcp.f32 %v436_v29  ;;  %vm476_vm13 = vmor %vm474_vm12, %vm475_vm11  ;;  %v493_v61 = vand.u32 2147483647, %v436_v29  ;;  %v495_v62 = vand.u32 2147483648, %v436_v29 }
  0xcd   :  { %v530_v37 = vmul.f32 %v467_v35, %v2638_v32  ;;  %v471_v38 = vsub.f32 1.0, %v470_v31  ;;  %2297 = vpow2.f32 %v1771_v33  ;;  %v404_v47 = vadd.f32 %v396_v44, %v322_v41  ;;  %v2701_v31 = vpop.permute.xlu2 %557 }
  0xce   :  { %vm489_vm0 = vweird.f32 %v436_v29  ;;  %v496_v5 = vor.u32 1.1754944e-38, %v495_v62  ;;  %vm494_vm2 = vcmp.eq.f32.partialorder %v493_v61, 8.507059e+37  ;;  %v2195_v61 = vld [vmem:[#allocation5 + $0x38] sm:$0xff]  ;;  %v2202_v62 = vld [vmem:[%s3007_s7 + $0x30] sm:$0xff] }
  0xcf   :  { %v472_v42 = vmul.f32 %v2294_v28, %v471_v38  ;;  %v566_v45 = vmul.f32 %v2684_v36, %v530_v37  ;;  %v2689_v32 = vadd.f32 %v2596_v13, %v404_v47  ;;  %1074 = vmatpush.bf16.msra.mxu0 %v2195_v61 }
  0xd0   :  { %v603_v1 = vld [vmem:[#allocation2] sm:$0xff] }
  0xd1   :  { %v473_v48 = vadd.f32 %v2294_v28, %v472_v42  ;;  %572 = vst [vmem:[#allocation2 + $0x9] sm:$0xff] %v566_v45  ;;  %v583_v49 = vpack.c.bf16 %v566_v45, %v565_v24  ;;  %v1772_v57 = vmul.f32 -1.442695, %v2689_v32 }
  0xd2   :  { %v2296_v50 = vpop.eup %2295 }
  0xd3   :  { %v2298_v52 = vpop.eup %2297  ;;  %v477_v53 = vsel %vm476_vm13, %v2294_v28, %v473_v48  ;;  %v485_v54 = vmul.f32 %v2296_v50, %v436_v29  ;;  %756 = vmatmul.bf16.vlgmr.msra.gmra.mxu1 %v583_v49  ;;  %vm490_vm15 = vweird.f32 %v2296_v50 }
  0xd4   :  { %v482_v55 = vsel %vm479_vm14, %v481_v51, %v477_v53  ;;  %v437_v56 = vadd.f32 1.0, %v2298_v52  ;;  %vm491_vm1 = vmor %vm489_vm0, %vm490_vm15 }
  0xd5   :  { %v531_v59 = vmul.f32 %v482_v55, %v2657_v46  ;;  %v486_v60 = vsub.f32 1.0, %v485_v54  ;;  %v2705_v47 = vpop.permute.xlu2 %562 }
  0xd6   :  { %2299 = vrcp.f32 %v437_v56  ;;  %v508_v17 = vand.u32 2147483647, %v437_v56  ;;  %v510_v18 = vand.u32 2147483648, %v437_v56  ;;  %vm504_vm4 = vweird.f32 %v437_v56 }
  0xd7   :  { %v487_v63 = vmul.f32 %v2296_v50, %v486_v60  ;;  %2301 = vpow2.f32 %v1772_v57  ;;  %v567_v13 = vmul.f32 %v2692_v58, %v531_v59 }
  0xd8   :  { %v604_v2 = vld [vmem:[#allocation2 + $0x8] sm:$0xff]  ;;  %vm509_vm6 = vcmp.eq.f32.partialorder %v508_v17, 8.507059e+37  ;;  %v2190_v17 = vld [vmem:[#allocation5 + $0x10] sm:$0xff] }
  0xd9   :  { %v488_v3 = vadd.f32 %v2296_v50, %v487_v63  ;;  %573 = vst [vmem:[#allocation2 + $0x11] sm:$0xff] %v567_v13  ;;  %v609_v4 = vpack.c.bf16 %v604_v2, %v603_v1  ;;  %v772_v20 = vld [vmem:[#allocation2 + $0x2] sm:$0xff]  ;;  %v235_v63 = vpop.f32.mrf.mxu1  ;;  %v2211_v2 = vld [vmem:[%s3007_s7 + $0x78] sm:$0xff] }
  0xda   :  { %1172 = vmatpush.bf16.msrb.mxu1 %v2211_v2 }
  0xdb   :  { %v492_v6 = vsel %vm491_vm1, %v2296_v50, %v488_v3  ;;  %684 = vmatmul.bf16.vlgmr.msrb.gmra.mxu0 %v609_v4  ;;  %v2201_v3 = vld [vmem:[%s3007_s7 + $0x28] sm:$0xff]  ;;  %v2194_v4 = vld [vmem:[#allocation5 + $0x30] sm:$0xff] }
  0xdc   :  { %v2300_v46 = vpop.eup %2299  ;;  %v497_v7 = vsel %vm494_vm2, %v496_v5, %v492_v6  ;;  %v2210_v5 = vld [vmem:[%s3007_s7 + $0x70] sm:$0xff]  ;;  %1075 = vmatpush.bf16.msra.mxu0 %v2194_v4 }
  0xdd   :  { %v2302_v9 = vpop.eup %2301  ;;  %v532_v10 = vmul.f32 %v497_v7, %v2670_v0  ;;  %v500_v11 = vmul.f32 %v2300_v46, %v437_v56  ;;  %vm505_vm3 = vweird.f32 %v2300_v46  ;;  %v511_v0 = vor.u32 1.1754944e-38, %v510_v18  ;;  %v2193_v7 = vld [vmem:[#allocation5 + $0x28] sm:$0xff] }
  0xde   :  { %v438_v12 = vadd.f32 1.0, %v2302_v9  ;;  %vm506_vm5 = vmor %vm504_vm4, %vm505_vm3  ;;  %1173 = vmatpush.bf16.msrb.mxu1 %v2210_v5  ;;  %v2209_v9 = vld [vmem:[%s3007_s7 + $0x68] sm:$0xff] }
  0xdf   :  { %v501_v15 = vsub.f32 1.0, %v500_v11  ;;  %v568_v16 = vmul.f32 %v2697_v14, %v532_v10  ;;  %v2192_v11 = vld [vmem:[#allocation5 + $0x20] sm:$0xff] }
  0xe0   :  { %2303 = vrcp.f32 %v438_v12  ;;  %v773_v21 = vld [vmem:[#allocation2 + $0xa] sm:$0xff]  ;;  %v525_v39 = vand.u32 2147483648, %v438_v12  ;;  %v523_v41 = vand.u32 2147483647, %v438_v12  ;;  %vm519_vm8 = vweird.f32 %v438_v12  ;;  %1076 = vmatpush.bf16.msra.mxu0 %v2193_v7 }
  0xe1   :  { %v502_v22 = vmul.f32 %v2300_v46, %v501_v15  ;;  %574 = vst [vmem:[#allocation2 + $0x19] sm:$0xff] %v568_v16  ;;  %v778_v23 = vpack.c.bf16 %v773_v21, %v772_v20  ;;  %v584_v24 = vpack.c.bf16 %v568_v16, %v567_v13  ;;  %v605_v33 = vld [vmem:[#allocation2 + $0x10] sm:$0xff]  ;;  %v2714_v13 = vpop.f32.mrf.mxu1  ;;  %v2199_v15 = vld [vmem:[%s3007_s7 + $0x18] sm:$0xff]  ;;  %v2208_v16 = vld [vmem:[%s3007_s7 + $0x60] sm:$0xff] }
  0xe2   :  { %v526_v43 = vor.u32 1.1754944e-38, %v525_v39  ;;  %vm524_vm10 = vcmp.eq.f32.partialorder %v523_v41, 8.507059e+37  ;;  %1174 = vmatpush.bf16.msrb.mxu1 %v2209_v9  ;;  %v2189_v20 = vld [vmem:[#allocation5 + $0x8] sm:$0xff]  ;;  %v2198_v21 = vld [vmem:[%s3007_s7 + $0x10] sm:$0xff]  ;;  %v2204_v39 = vld [vmem:[%s3007_s7 + $0x40] sm:$0xff] }
  0xe3   :  { %v503_v25 = vadd.f32 %v2300_v46, %v502_v22  ;;  %854 = vmatmul.bf16.vlgmr.msrb.gmra.mxu2 %v778_v23  ;;  %761 = vmatmul.bf16.gmra.mxu1 %v584_v24  ;;  %v2207_v22 = vld [vmem:[%s3007_s7 + $0x58] sm:$0xff]  ;;  %v2197_v23 = vld [vmem:[%s3007_s7 + $0x8] sm:$0xff]  ;;  %v2188_v24 = vld [vmem:[#allocation5] sm:$0xff] }
  0xe4   :  { %1077 = vmatpush.bf16.msra.mxu0 %v2192_v11 }
  0xe5   :  { %v507_v26 = vsel %vm506_vm5, %v2300_v46, %v503_v25  ;;  %v2200_v46 = vld [vmem:[%s3007_s7 + $0x20] sm:$0xff] }
  0xe6   :  { %v2304_v28 = vpop.eup %2303  ;;  %v512_v19 = vsel %vm509_vm6, %v511_v0, %v507_v26  ;;  %1175 = vmatpush.bf16.msrb.mxu1 %v2208_v16  ;;  %v2206_v26 = vld [vmem:[%s3007_s7 + $0x50] sm:$0xff] }
  0xe7   :  { %v533_v29 = vmul.f32 %v512_v19, %v2681_v27  ;;  %v515_v30 = vmul.f32 %v2304_v28, %v438_v12  ;;  %vm520_vm7 = vweird.f32 %v2304_v28  ;;  %v2191_v12 = vld [vmem:[#allocation5 + $0x18] sm:$0xff] }
  0xe8   :  { %v606_v34 = vld [vmem:[#allocation2 + $0x18] sm:$0xff]  ;;  %vm521_vm9 = vmor %vm519_vm8, %vm520_vm7  ;;  %1078 = vmatpush.bf16.msra.mxu0 %v2191_v12  ;;  %v2205_v19 = vld [vmem:[%s3007_s7 + $0x48] sm:$0xff] }
  0xe9   :  { %v516_v35 = vsub.f32 1.0, %v515_v30  ;;  %v569_v37 = vmul.f32 %v2701_v31, %v533_v29  ;;  %v610_v38 = vpack.c.bf16 %v606_v34, %v605_v33  ;;  %v774_v48 = vld [vmem:[#allocation2 + $0x12] sm:$0xff]  ;;  %v2716_v1 = vpop.f32.mrf.mxu1  ;;  %v2766_v33 = vld [vmem:[%s3006_s6] ss:$0 sm:$0xff] }
  0xea   :  { %1176 = vmatpush.bf16.msrb.mxu1 %v2207_v22 }
  0xeb   :  { %v517_v40 = vmul.f32 %v2304_v28, %v516_v35  ;;  %575 = vst [vmem:[#allocation2 + $0x21] sm:$0xff] %v569_v37  ;;  %689 = vmatmul.bf16.gmra.mxu0 %v610_v38 }
  0xec   :  { %1079 = vmatpush.bf16.msra.mxu0 %v2190_v17 }
  0xed   :  { %v518_v42 = vadd.f32 %v2304_v28, %v517_v40 }
  0xee   :  { %1177 = vmatpush.bf16.msrb.mxu1 %v2206_v26 }
  0xef   :  { %v522_v27 = vsel %vm521_vm9, %v2304_v28, %v518_v42  ;;  %v2196_v28 = vld [vmem:[%s3007_s7] sm:$0xff] }
  0xf0   :  { %v527_v44 = vsel %vm524_vm10, %v526_v43, %v522_v27  ;;  %1080 = vmatpush.bf16.msra.mxu0 %v2189_v20 }
  0xf1   :  { %v534_v45 = vmul.f32 %v527_v44, %v2689_v32  ;;  %v2203_v32 = vld [vmem:[%s3007_s7 + $0x38] sm:$0xff]  ;;  %v2727_v6 = vpop.f32.mrf.mxu1 }
  0xf2   :  { %v775_v49 = vld [vmem:[#allocation2 + $0x1a] sm:$0xff]  ;;  %1002 = vmatpush.bf16.msrb.mxu3 %v2203_v32  ;;  %1178 = vmatpush.bf16.msrb.mxu1 %v2205_v19 }
  0xf3   :  { %v570_v50 = vmul.f32 %v2705_v47, %v534_v45  ;;  %v779_v51 = vpack.c.bf16 %v775_v49, %v774_v48  ;;  %v607_v52 = vld [vmem:[#allocation2 + $0x20] sm:$0xff] }
  0xf4   :  { %1081 = vmatpush.bf16.msra.mxu0 %v2188_v24 }
  0xf5   :  { %576 = vst [vmem:[#allocation2 + $0x29] sm:$0x3f] %v570_v50  ;;  %859 = vmatmul.bf16.gmra.mxu2 %v779_v51 }
  0xf6   :  { %1003 = vmatpush.bf16.msrb.mxu3 %v2202_v62  ;;  %1179 = vmatpush.bf16.msrb.mxu1 %v2204_v39 }
  0xf9   :  { %v2735_v10 = vpop.f32.mrf.mxu1 }
  0xfa   :  { %1004 = vmatpush.bf16.msrb.mxu3 %v2201_v3 }
  0xfc   :  { %v608_v53 = vld [vmem:[#allocation2 + $0x28] sm:$0x3f] }
  0xfd   :  { %v582_v54 = vld [vmem:[#allocation2 + $0x29] sm:$0x3f]  ;;  %v611_v55 = vpack.c.bf16 %v608_v53, %v607_v52 }
  0xfe   :  { %v585_v56 = vpack.c.bf16 %v582_v54, %v569_v37  ;;  %v776_v57 = vld [vmem:[#allocation2 + $0x22] sm:$0xff]  ;;  %v777_v59 = vld [vmem:[#allocation2 + $0x2a] sm:$0x3f]  ;;  %1005 = vmatpush.bf16.msrb.mxu3 %v2200_v46 }
  0xff   :  { %694 = vmatmul.bf16.gmra.mxu0 %v611_v55  ;;  %v780_v60 = vpack.c.bf16 %v777_v59, %v776_v57 }
 0x100   :  { %766 = vmatmul.bf16.gmra.mxu1 %v585_v56 }
 0x101   :  { %v2743_v18 = vpop.f32.mrf.mxu1 }
 0x102   :  { %1006 = vmatpush.bf16.msrb.mxu3 %v2199_v15 }
 0x105   :  { %864 = vmatmul.bf16.gmra.mxu2 %v780_v60 }
 0x106   :  { %1007 = vmatpush.bf16.msrb.mxu3 %v2198_v21 }
 0x10a   :  { %1008 = vmatpush.bf16.msrb.mxu3 %v2197_v23 }
 0x10e   :  { %1009 = vmatpush.bf16.msrb.mxu3 %v2196_v28 }
 0x150   :  { %v757_v0 = vpop.f32.mrf.mxu1 }
 0x158   :  { %v685_v25 = vpop.f32.mrf.mxu0  ;;  %v759_v34 = vpop.f32.mrf.mxu1 }
 0x159   :  { %v758_v30 = vadd.f32 %v757_v0, %v685_v25 }
 0x160   :  { %v687_v29 = vpop.f32.mrf.mxu0  ;;  %v762_v45 = vpop.f32.mrf.mxu1 }
 0x161   :  { %v760_v41 = vadd.f32 %v759_v34, %v687_v29 }
 0x166   :  { %v855_v35 = vpop.f32.mrf.mxu2 }
 0x167   :  { %v870_v37 = vadd.f32 %v855_v35, %v758_v30 }
 0x168   :  { %v690_v43 = vpop.f32.mrf.mxu0  ;;  %v764_v56 = vpop.f32.mrf.mxu1 }
 0x169   :  { %v880_v38 = vadd.f32 %v2766_v33, %v870_v37  ;;  %v763_v51 = vadd.f32 %v762_v45, %v690_v43  ;;  %v2218_v45 = vld [vmem:[%s3010_s10 + $0x70] sm:$0xff] }
 0x16b   :  { %v886_v40 = vadd.f32 %v880_v38, %v235_v63 }
 0x16d   :  { %v2773_v42 = vmul.f32 %v886_v40, %v2673_v8 }
 0x16e   :  { %v857_v27 = vpop.f32.mrf.mxu2 }
 0x16f   :  { %898 = vst [vmem:[#allocation2 + $0x1] sm:$0xff] %v2773_v42  ;;  %v871_v44 = vadd.f32 %v857_v27, %v760_v41 }
 0x170   :  { %v692_v53 = vpop.f32.mrf.mxu0 }
 0x171   :  { %v881_v48 = vadd.f32 %v2766_v33, %v871_v44  ;;  %v765_v61 = vadd.f32 %v764_v56, %v692_v53  ;;  %v2219_v44 = vld [vmem:[%s3010_s10 + $0x78] sm:$0xff]  ;;  %v2829_v56 = vld [vmem:[#allocation7] ss:$0 sm:$0xff] }
 0x172   :  { %1515 = vmatpush.bf16.msra.mxu3 %v2219_v44 }
 0x173   :  { %v887_v49 = vadd.f32 %v881_v48, %v2714_v13 }
 0x175   :  { %v2779_v50 = vmul.f32 %v887_v49, %v2684_v36  ;;  %v2227_v49 = vld [vmem:[%s3010_s10 + $0x38] sm:$0xff] }
 0x176   :  { %v929_v60 = vld [vmem:[#allocation2] sm:$0xff]  ;;  %1516 = vmatpush.bf16.msra.mxu3 %v2218_v45  ;;  %1443 = vmatpush.bf16.msra.mxu2 %v2227_v49 }
 0x177   :  { %899 = vst [vmem:[#allocation2 + $0x9] sm:$0xff] %v2779_v50  ;;  %v910_v52 = vpack.c.bf16 %v2779_v50, %v2773_v42 }
 0x178   :  { %v860_v54 = vpop.f32.mrf.mxu2 }
 0x179   :  { %v872_v55 = vadd.f32 %v860_v54, %v763_v51  ;;  %1082 = vmatmul.bf16.vlgmr.msra.gmra.mxu0 %v910_v52  ;;  %v2217_v51 = vld [vmem:[%s3010_s10 + $0x68] sm:$0xff]  ;;  %v2226_v54 = vld [vmem:[%s3010_s10 + $0x30] sm:$0xff] }
 0x17a   :  { %1517 = vmatpush.bf16.msra.mxu3 %v2217_v51  ;;  %1444 = vmatpush.bf16.msra.mxu2 %v2226_v54 }
 0x17b   :  { %v882_v57 = vadd.f32 %v2766_v33, %v872_v55  ;;  %v2216_v55 = vld [vmem:[%s3010_s10 + $0x60] sm:$0xff] }
 0x17c   :  { %v695_v3 = vpop.f32.mrf.mxu0 }
 0x17d   :  { %v888_v59 = vadd.f32 %v882_v57, %v2716_v1  ;;  %v767_v4 = vpop.f32.mrf.mxu1 }
 0x17e   :  { %v930_v32 = vld [vmem:[#allocation2 + $0x8] sm:$0xff]  ;;  %v768_v7 = vadd.f32 %v767_v4, %v695_v3  ;;  %1518 = vmatpush.bf16.msra.mxu3 %v2216_v55 }
 0x17f   :  { %v2787_v62 = vmul.f32 %v888_v59, %v2692_v58  ;;  %v935_v63 = vpack.c.bf16 %v930_v32, %v929_v60  ;;  %v1098_v11 = vld [vmem:[#allocation2 + $0x2] sm:$0xff]  ;;  %v2837_v32 = vld [vmem:[%s3010_s10 + $0xb8] sm:$0xff] }
 0x180   :  { %v862_v13 = vpop.f32.mrf.mxu2  ;;  %v2225_v60 = vld [vmem:[%s3010_s10 + $0x28] sm:$0xff]  ;;  %1613 = vmatpush.bf16.msrb.mxu0 %v2837_v32 }
 0x181   :  { %900 = vst [vmem:[#allocation2 + $0x11] sm:$0xff] %v2787_v62  ;;  %v873_v2 = vadd.f32 %v862_v13, %v765_v61  ;;  %1010 = vmatmul.bf16.vlgmr.msrb.gmra.mxu3 %v935_v63  ;;  %v2215_v63 = vld [vmem:[%s3010_s10 + $0x58] sm:$0xff]  ;;  %1445 = vmatpush.bf16.msra.mxu2 %v2225_v60 }
 0x182   :  { %1519 = vmatpush.bf16.msra.mxu3 %v2215_v63 }
 0x183   :  { %v883_v5 = vadd.f32 %v2766_v33, %v873_v2 }
 0x184   :  { %v697_v21 = vpop.f32.mrf.mxu0 }
 0x185   :  { %v889_v46 = vadd.f32 %v883_v5, %v2727_v6  ;;  %v769_v6 = vpop.f32.mrf.mxu1  ;;  %v2224_v5 = vld [vmem:[%s3010_s10 + $0x20] sm:$0xff] }
 0x186   :  { %v770_v23 = vadd.f32 %v769_v6, %v697_v21  ;;  %1446 = vmatpush.bf16.msra.mxu2 %v2224_v5 }
 0x187   :  { %v2793_v1 = vmul.f32 %v889_v46, %v2697_v14  ;;  %v2853_v46 = vld [vmem:[%s3010_s10 + $0xb0] sm:$0xff] }
 0x188   :  { %v865_v9 = vpop.f32.mrf.mxu2  ;;  %v1099_v12 = vld [vmem:[#allocation2 + $0xa] sm:$0xff]  ;;  %1614 = vmatpush.bf16.msrb.mxu0 %v2853_v46 }
 0x189   :  { %901 = vst [vmem:[#allocation2 + $0x19] sm:$0xff] %v2793_v1  ;;  %v874_v15 = vadd.f32 %v865_v9, %v768_v7  ;;  %v1104_v16 = vpack.c.bf16 %v1099_v12, %v1098_v11  ;;  %v911_v17 = vpack.c.bf16 %v2793_v1, %v2787_v62  ;;  %v931_v0 = vld [vmem:[#allocation2 + $0x10] sm:$0xff]  ;;  %v2223_v12 = vld [vmem:[%s3010_s10 + $0x18] sm:$0xff] }
 0x18a   :  { %v2214_v7 = vld [vmem:[%s3010_s10 + $0x50] sm:$0xff]  ;;  %1447 = vmatpush.bf16.msra.mxu2 %v2223_v12 }
 0x18b   :  { %v884_v20 = vadd.f32 %v2766_v33, %v874_v15  ;;  %1180 = vmatmul.bf16.vlgmr.msrb.gmra.mxu1 %v1104_v16  ;;  %1087 = vmatmul.bf16.gmra.mxu0 %v911_v17  ;;  %v2865_v15 = vld [vmem:[%s3010_s10 + $0xa8] sm:$0xff] }
 0x18c   :  { %1520 = vmatpush.bf16.msra.mxu3 %v2214_v7  ;;  %v2213_v16 = vld [vmem:[%s3010_s10 + $0x48] sm:$0xff]  ;;  %1615 = vmatpush.bf16.msrb.mxu0 %v2865_v15 }
 0x18d   :  { %v890_v22 = vadd.f32 %v884_v20, %v2735_v10 }
 0x18f   :  { %v2801_v24 = vmul.f32 %v890_v22, %v2701_v31  ;;  %v2222_v22 = vld [vmem:[%s3010_s10 + $0x10] sm:$0xff] }
 0x190   :  { %v867_v25 = vpop.f32.mrf.mxu2  ;;  %v932_v26 = vld [vmem:[#allocation2 + $0x18] sm:$0xff]  ;;  %1521 = vmatpush.bf16.msra.mxu3 %v2213_v16  ;;  %1448 = vmatpush.bf16.msra.mxu2 %v2222_v22 }
 0x191   :  { %902 = vst [vmem:[#allocation2 + $0x21] sm:$0xff] %v2801_v24  ;;  %v875_v28 = vadd.f32 %v867_v25, %v770_v23  ;;  %v936_v19 = vpack.c.bf16 %v932_v26, %v931_v0  ;;  %v1100_v10 = vld [vmem:[#allocation2 + $0x12] sm:$0xff]  ;;  %v2881_v0 = vld [vmem:[%s3010_s10 + $0xa0] sm:$0xff] }
 0x192   :  { %v2212_v26 = vld [vmem:[%s3010_s10 + $0x40] sm:$0xff]  ;;  %1616 = vmatpush.bf16.msrb.mxu0 %v2881_v0 }
 0x193   :  { %v885_v29 = vadd.f32 %v2766_v33, %v875_v28  ;;  %1015 = vmatmul.bf16.gmra.mxu3 %v936_v19 }
 0x194   :  { %1522 = vmatpush.bf16.msra.mxu3 %v2212_v26 }
 0x195   :  { %v891_v30 = vadd.f32 %v885_v29, %v2743_v18 }
 0x197   :  { %v2807_v34 = vmul.f32 %v891_v30, %v2705_v47  ;;  %v2221_v30 = vld [vmem:[%s3010_s10 + $0x8] sm:$0xff] }
 0x198   :  { %v1101_v35 = vld [vmem:[#allocation2 + $0x1a] sm:$0xff]  ;;  %1449 = vmatpush.bf16.msra.mxu2 %v2221_v30 }
 0x199   :  { %903 = vst [vmem:[#allocation2 + $0x29] sm:$0x3f] %v2807_v34  ;;  %v1105_v37 = vpack.c.bf16 %v1101_v35, %v1100_v10  ;;  %v933_v38 = vld [vmem:[#allocation2 + $0x20] sm:$0xff]  ;;  %v2893_v10 = vld [vmem:[%s3010_s10 + $0x98] sm:$0xff] }
 0x19a   :  { %1617 = vmatpush.bf16.msrb.mxu0 %v2893_v10 }
 0x19b   :  { %1185 = vmatmul.bf16.gmra.mxu1 %v1105_v37 }
 0x1a0   :  { %v934_v39 = vld [vmem:[#allocation2 + $0x28] sm:$0x3f] }
 0x1a1   :  { %v909_v40 = vld [vmem:[#allocation2 + $0x29] sm:$0x3f]  ;;  %v937_v41 = vpack.c.bf16 %v934_v39, %v933_v38 }
 0x1a2   :  { %v912_v43 = vpack.c.bf16 %v909_v40, %v2801_v24  ;;  %v1102_v33 = vld [vmem:[#allocation2 + $0x22] sm:$0xff]  ;;  %v1103_v27 = vld [vmem:[#allocation2 + $0x2a] sm:$0x3f] }
 0x1a3   :  { %1020 = vmatmul.bf16.gmra.mxu3 %v937_v41  ;;  %v1106_v18 = vpack.c.bf16 %v1103_v27, %v1102_v33  ;;  %v2220_v33 = vld [vmem:[%s3010_s10] sm:$0xff]  ;;  %v2908_v27 = vld [vmem:[%s3010_s10 + $0x90] sm:$0xff] }
 0x1a4   :  { %1092 = vmatmul.bf16.gmra.mxu0 %v912_v43  ;;  %1450 = vmatpush.bf16.msra.mxu2 %v2220_v33 }
 0x1a5   :  { %1618 = vmatpush.bf16.msrb.mxu0 %v2908_v27 }
 0x1a8   :  { %2257 = vmatpush.bf16.msrb.mxu2 %v2837_v32 }
 0x1ab   :  { %1190 = vmatmul.bf16.gmra.mxu1 %v1106_v18 }
 0x1ac   :  { %2258 = vmatpush.bf16.msrb.mxu2 %v2853_v46 }
 0x1b0   :  { %2259 = vmatpush.bf16.msrb.mxu2 %v2865_v15 }
 0x1b4   :  { %2260 = vmatpush.bf16.msrb.mxu2 %v2881_v0 }
 0x1b8   :  { %2261 = vmatpush.bf16.msrb.mxu2 %v2893_v10 }
 0x1bc   :  { %2262 = vmatpush.bf16.msrb.mxu2 %v2908_v27 }
 0x1f6   :  { %v1083_v48 = vpop.f32.mrf.mxu0 }
 0x1fe   :  { %v1085_v61 = vpop.f32.mrf.mxu0 }
 0x204   :  { %v1011_v52 = vpop.f32.mrf.mxu3 }
 0x205   :  { %v1084_v53 = vadd.f32 %v1083_v48, %v1011_v52  ;;  %v2916_v52 = vld [vmem:[%s3010_s10 + $0x88] sm:$0xff] }
 0x206   :  { %1619 = vmatpush.bf16.msrb.mxu0 %v2916_v52  ;;  %2263 = vmatpush.bf16.msrb.mxu2 %v2916_v52 }
 0x208   :  { %v1181_v57 = vpop.f32.mrf.mxu1  ;;  %v1088_v20 = vpop.f32.mrf.mxu0 }
 0x209   :  { %v1196_v59 = vadd.f32 %v1181_v57, %v1084_v53 }
 0x20b   :  { %v2843_v13 = vadd.f32 %v2829_v56, %v1196_v59 }
 0x20c   :  { %v1013_v2 = vpop.f32.mrf.mxu3 }
 0x20d   :  { %v2013_v3 = vmul.f32 -1.442695, %v2843_v13  ;;  %v1086_v4 = vadd.f32 %v1085_v61, %v1013_v2 }
 0x20f   :  { %2305 = vpow2.f32 %v2013_v3  ;;  %v2929_v3 = vld [vmem:[%s3010_s10 + $0x80] sm:$0xff] }
 0x210   :  { %v1183_v9 = vpop.f32.mrf.mxu1  ;;  %v1090_v41 = vpop.f32.mrf.mxu0  ;;  %1620 = vmatpush.bf16.msrb.mxu0 %v2929_v3  ;;  %2264 = vmatpush.bf16.msrb.mxu2 %v2929_v3 }
 0x211   :  { %v1197_v11 = vadd.f32 %v1183_v9, %v1086_v4 }
 0x213   :  { %v2871_v17 = vadd.f32 %v2829_v56, %v1197_v11 }
 0x215   :  { %v2306_v21 = vpop.eup %2305  ;;  %v2014_v6 = vmul.f32 -1.442695, %v2871_v17 }
 0x216   :  { %v1230_v23 = vadd.f32 1.0, %v2306_v21  ;;  %v1016_v25 = vpop.f32.mrf.mxu3 }
 0x217   :  { %2307 = vpow2.f32 %v2014_v6  ;;  %v1089_v28 = vadd.f32 %v1088_v20, %v1016_v25 }
 0x218   :  { %2309 = vrcp.f32 %v1230_v23  ;;  %v1186_v19 = vpop.f32.mrf.mxu1  ;;  %v1247_v51 = vand.u32 2147483648, %v1230_v23  ;;  %v1245_v54 = vand.u32 2147483647, %v1230_v23  ;;  %vm1241_vm12 = vweird.f32 %v1230_v23 }
 0x219   :  { %v1198_v29 = vadd.f32 %v1186_v19, %v1089_v28 }
 0x21a   :  { %v1248_v61 = vor.u32 1.1754944e-38, %v1247_v51  ;;  %vm1246_vm14 = vcmp.eq.f32.partialorder %v1245_v54, 8.507059e+37 }
 0x21b   :  { %v2896_v35 = vadd.f32 %v2829_v56, %v1198_v29 }
 0x21d   :  { %v2308_v37 = vpop.eup %2307  ;;  %v2015_v38 = vmul.f32 -1.442695, %v2896_v35 }
 0x21e   :  { %v2310_v39 = vpop.eup %2309  ;;  %v2900_v40 = vadd.f32 1.0, %v2308_v37  ;;  %v1018_v43 = vpop.f32.mrf.mxu3 }
 0x21f   :  { %v1237_v18 = vmul.f32 %v2310_v39, %v1230_v23  ;;  %2311 = vpow2.f32 %v2015_v38  ;;  %v1091_v44 = vadd.f32 %v1090_v41, %v1018_v43  ;;  %vm1242_vm11 = vweird.f32 %v2310_v39 }
 0x220   :  { %2313 = vrcp.f32 %v2900_v40  ;;  %v1188_v45 = vpop.f32.mrf.mxu1  ;;  %vm1243_vm13 = vmor %vm1241_vm12, %vm1242_vm11  ;;  %v1260_v20 = vand.u32 2147483647, %v2900_v40  ;;  %v1262_v21 = vand.u32 2147483648, %v2900_v40  ;;  %vm1256_vm0 = vweird.f32 %v2900_v40 }
 0x221   :  { %v1238_v48 = vsub.f32 1.0, %v1237_v18  ;;  %v1199_v49 = vadd.f32 %v1188_v45, %v1091_v44  ;;  %v1093_v7 = vpop.f32.mrf.mxu0 }
 0x222   :  { %v1263_v28 = vor.u32 1.1754944e-38, %v1262_v21  ;;  %vm1261_vm2 = vcmp.eq.f32.partialorder %v1260_v20, 8.507059e+37 }
 0x223   :  { %v1239_v53 = vmul.f32 %v2310_v39, %v1238_v48  ;;  %v2919_v55 = vadd.f32 %v2829_v56, %v1199_v49 }
 0x225   :  { %v2312_v57 = vpop.eup %2311  ;;  %v1240_v59 = vadd.f32 %v2310_v39, %v1239_v53  ;;  %v2016_v60 = vmul.f32 -1.442695, %v2919_v55 }
 0x226   :  { %v2314_v32 = vpop.eup %2313  ;;  %v2924_v63 = vadd.f32 1.0, %v2312_v57  ;;  %v1021_v2 = vpop.f32.mrf.mxu3 }
 0x227   :  { %v1244_v4 = vsel %vm1243_vm13, %v2310_v39, %v1240_v59  ;;  %v1252_v5 = vmul.f32 %v2314_v32, %v2900_v40  ;;  %2315 = vpow2.f32 %v2016_v60  ;;  %v1094_v16 = vadd.f32 %v1093_v7, %v1021_v2 }
 0x228   :  { %v1249_v9 = vsel %vm1246_vm14, %v1248_v61, %v1244_v4  ;;  %2317 = vrcp.f32 %v2924_v63  ;;  %v1191_v46 = vpop.f32.mrf.mxu1  ;;  %vm1257_vm15 = vweird.f32 %v2314_v32  ;;  %v1277_v0 = vand.u32 2147483648, %v2924_v63 }
 0x229   :  { %v1326_v11 = vmul.f32 %v1249_v9, %v2843_v13  ;;  %v1253_v12 = vsub.f32 1.0, %v1252_v5  ;;  %v1200_v23 = vadd.f32 %v1191_v46, %v1094_v16  ;;  %vm1258_vm1 = vmor %vm1256_vm0, %vm1257_vm15  ;;  %v1095_v43 = vpop.f32.mrf.mxu0  ;;  %v1275_v48 = vand.u32 2147483647, %v2924_v63 }
 0x22a   :  { %vm1271_vm4 = vweird.f32 %v2924_v63  ;;  %v1278_v10 = vor.u32 1.1754944e-38, %v1277_v0 }
 0x22b   :  { %v1332_v6 = vmul.f32 %v1326_v11, %v2673_v8  ;;  %v1254_v22 = vmul.f32 %v2314_v32, %v1253_v12  ;;  %v2941_v13 = vadd.f32 %v2829_v56, %v1200_v23  ;;  %vm1276_vm6 = vcmp.eq.f32.partialorder %v1275_v48, 8.507059e+37 }
 0x22d   :  { %v2316_v25 = vpop.eup %2315  ;;  %1338 = vst [vmem:[#allocation2 + $0x1] sm:$0xff] %v1332_v6  ;;  %v1255_v26 = vadd.f32 %v2314_v32, %v1254_v22  ;;  %v2017_v37 = vmul.f32 -1.442695, %v2941_v13 }
 0x22e   :  { %v2318_v15 = vpop.eup %2317  ;;  %v1233_v19 = vadd.f32 1.0, %v2316_v25  ;;  %v1023_v38 = vpop.f32.mrf.mxu3 }
 0x22f   :  { %v1259_v29 = vsel %vm1258_vm1, %v2314_v32, %v1255_v26  ;;  %v1267_v30 = vmul.f32 %v2318_v15, %v2924_v63  ;;  %v1096_v18 = vadd.f32 %v1095_v43, %v1023_v38  ;;  %vm1272_vm3 = vweird.f32 %v2318_v15 }
 0x230   :  { %v1264_v39 = vsel %vm1261_vm2, %v1263_v28, %v1259_v29  ;;  %2319 = vrcp.f32 %v1233_v19  ;;  %v1193_v33 = vpop.f32.mrf.mxu1  ;;  %vm1273_vm5 = vmor %vm1271_vm4, %vm1272_vm3  ;;  %v1290_v27 = vand.u32 2147483647, %v1233_v19  ;;  %v1292_v5 = vand.u32 2147483648, %v1233_v19 }
 0x231   :  { %v1327_v40 = vmul.f32 %v1264_v39, %v2871_v17  ;;  %v1268_v41 = vsub.f32 1.0, %v1267_v30  ;;  %2321 = vpow2.f32 %v2017_v37  ;;  %v1201_v49 = vadd.f32 %v1193_v33, %v1096_v18 }
 0x232   :  { %vm1286_vm8 = vweird.f32 %v1233_v19  ;;  %vm1291_vm10 = vcmp.eq.f32.partialorder %v1290_v27, 8.507059e+37 }
 0x233   :  { %v1333_v44 = vmul.f32 %v1327_v40, %v2684_v36  ;;  %v1269_v45 = vmul.f32 %v2318_v15, %v1268_v41  ;;  %v2954_v54 = vadd.f32 %v2829_v56, %v1201_v49 }
 0x234   :  { %v1370_v9 = vld [vmem:[#allocation2] sm:$0xff] }
 0x235   :  { %1339 = vst [vmem:[#allocation2 + $0x9] sm:$0xff] %v1333_v44  ;;  %v1270_v51 = vadd.f32 %v2318_v15, %v1269_v45  ;;  %v1350_v17 = vpack.c.bf16 %v1333_v44, %v1332_v6  ;;  %v2018_v2 = vmul.f32 -1.442695, %v2954_v54 }
 0x236   :  { %v2320_v53 = vpop.eup %2319 }
 0x237   :  { %v2322_v57 = vpop.eup %2321  ;;  %v1274_v59 = vsel %vm1273_vm5, %v2318_v15, %v1270_v51  ;;  %v1282_v60 = vmul.f32 %v2320_v53, %v1233_v19  ;;  %1523 = vmatmul.bf16.vlgmr.msra.gmra.mxu3 %v1350_v17  ;;  %vm1287_vm7 = vweird.f32 %v2320_v53 }
 0x238   :  { %v1279_v32 = vsel %vm1276_vm6, %v1278_v10, %v1274_v59  ;;  %v1234_v61 = vadd.f32 1.0, %v2322_v57  ;;  %vm1288_vm9 = vmor %vm1286_vm8, %vm1287_vm7 }
 0x239   :  { %v1328_v63 = vmul.f32 %v1279_v32, %v2896_v35  ;;  %v1283_v4 = vsub.f32 1.0, %v1282_v60  ;;  %v1293_v35 = vor.u32 1.1754944e-38, %v1292_v5 }
 0x23a   :  { %2323 = vrcp.f32 %v1234_v61  ;;  %v1305_v15 = vand.u32 2147483647, %v1234_v61  ;;  %v1307_v28 = vand.u32 2147483648, %v1234_v61  ;;  %vm1301_vm12 = vweird.f32 %v1234_v61 }
 0x23b   :  { %v1334_v56 = vmul.f32 %v1328_v63, %v2692_v58  ;;  %v1284_v7 = vmul.f32 %v2320_v53, %v1283_v4  ;;  %2325 = vpow2.f32 %v2018_v2 }
 0x23c   :  { %v1371_v46 = vld [vmem:[#allocation2 + $0x8] sm:$0xff]  ;;  %vm1306_vm14 = vcmp.eq.f32.partialorder %v1305_v15, 8.507059e+37 }
 0x23d   :  { %1340 = vst [vmem:[#allocation2 + $0x11] sm:$0xff] %v1334_v56  ;;  %v1285_v11 = vadd.f32 %v2320_v53, %v1284_v7  ;;  %v1376_v12 = vpack.c.bf16 %v1371_v46, %v1370_v9  ;;  %v1539_v19 = vld [vmem:[#allocation2 + $0x2] sm:$0xff] }
 0x23f   :  { %v1289_v16 = vsel %vm1288_vm9, %v2320_v53, %v1285_v11  ;;  %1451 = vmatmul.bf16.vlgmr.msra.gmra.mxu2 %v1376_v12 }
 0x240   :  { %v2324_v52 = vpop.eup %2323  ;;  %v1294_v20 = vsel %vm1291_vm10, %v1293_v35, %v1289_v16  ;;  %v2280_v35 = vld [vmem:[%s3011_s11] ss:$0 sm:$0xff] }
 0x241   :  { %v2326_v21 = vpop.eup %2325  ;;  %v1329_v6 = vmul.f32 %v1294_v20, %v2919_v55  ;;  %v1297_v22 = vmul.f32 %v2324_v52, %v1234_v61  ;;  %vm1302_vm11 = vweird.f32 %v2324_v52  ;;  %v1308_v55 = vor.u32 1.1754944e-38, %v1307_v28 }
 0x242   :  { %v1235_v23 = vadd.f32 1.0, %v2326_v21  ;;  %vm1303_vm13 = vmor %vm1301_vm12, %vm1302_vm11 }
 0x243   :  { %v1335_v25 = vmul.f32 %v1329_v6, %v2697_v14  ;;  %v1298_v26 = vsub.f32 1.0, %v1297_v22 }
 0x244   :  { %2327 = vrcp.f32 %v1235_v23  ;;  %v1540_v3 = vld [vmem:[#allocation2 + $0xa] sm:$0xff]  ;;  %v1322_v49 = vand.u32 2147483648, %v1235_v23  ;;  %v1320_v17 = vand.u32 2147483647, %v1235_v23  ;;  %vm1316_vm0 = vweird.f32 %v1235_v23 }
 0x245   :  { %1341 = vst [vmem:[#allocation2 + $0x19] sm:$0xff] %v1335_v25  ;;  %v1299_v29 = vmul.f32 %v2324_v52, %v1298_v26  ;;  %v1545_v30 = vpack.c.bf16 %v1540_v3, %v1539_v19  ;;  %v1351_v37 = vpack.c.bf16 %v1335_v25, %v1334_v56  ;;  %v1372_v0 = vld [vmem:[#allocation2 + $0x10] sm:$0xff] }
 0x246   :  { %v1323_v10 = vor.u32 1.1754944e-38, %v1322_v49  ;;  %vm1321_vm2 = vcmp.eq.f32.partialorder %v1320_v17, 8.507059e+37 }
 0x247   :  { %v1300_v38 = vadd.f32 %v2324_v52, %v1299_v29  ;;  %1621 = vmatmul.bf16.vlgmr.msrb.gmra.mxu0 %v1545_v30  ;;  %1528 = vmatmul.bf16.gmra.mxu3 %v1351_v37 }
 0x249   :  { %v1304_v39 = vsel %vm1303_vm13, %v2324_v52, %v1300_v38 }
 0x24a   :  { %v2328_v40 = vpop.eup %2327  ;;  %v1309_v41 = vsel %vm1306_vm14, %v1308_v55, %v1304_v39 }
 0x24b   :  { %v1330_v43 = vmul.f32 %v1309_v41, %v2941_v13  ;;  %v1312_v33 = vmul.f32 %v2328_v40, %v1235_v23  ;;  %vm1317_vm15 = vweird.f32 %v2328_v40 }
 0x24c   :  { %v1373_v18 = vld [vmem:[#allocation2 + $0x18] sm:$0xff]  ;;  %vm1318_vm1 = vmor %vm1316_vm0, %vm1317_vm15 }
 0x24d   :  { %v1336_v44 = vmul.f32 %v1330_v43, %v2701_v31  ;;  %v1313_v45 = vsub.f32 1.0, %v1312_v33  ;;  %v1377_v48 = vpack.c.bf16 %v1373_v18, %v1372_v0  ;;  %v1541_v60 = vld [vmem:[#allocation2 + $0x12] sm:$0xff] }
 0x24f   :  { %1342 = vst [vmem:[#allocation2 + $0x21] sm:$0xff] %v1336_v44  ;;  %v1314_v51 = vmul.f32 %v2328_v40, %v1313_v45  ;;  %1456 = vmatmul.bf16.gmra.mxu2 %v1377_v48 }
 0x251   :  { %v1315_v53 = vadd.f32 %v2328_v40, %v1314_v51 }
 0x253   :  { %v1319_v57 = vsel %vm1318_vm1, %v2328_v40, %v1315_v53 }
 0x254   :  { %v1324_v13 = vsel %vm1321_vm2, %v1323_v10, %v1319_v57 }
 0x255   :  { %v1331_v59 = vmul.f32 %v1324_v13, %v2954_v54 }
 0x256   :  { %v1542_v32 = vld [vmem:[#allocation2 + $0x1a] sm:$0xff] }
 0x257   :  { %v1337_v61 = vmul.f32 %v1331_v59, %v2705_v47  ;;  %v1546_v2 = vpack.c.bf16 %v1542_v32, %v1541_v60  ;;  %v1374_v63 = vld [vmem:[#allocation2 + $0x20] sm:$0xff] }
 0x259   :  { %1343 = vst [vmem:[#allocation2 + $0x29] sm:$0x3f] %v1337_v61  ;;  %1626 = vmatmul.bf16.gmra.mxu0 %v1546_v2 }
 0x260   :  { %v1375_v4 = vld [vmem:[#allocation2 + $0x28] sm:$0x3f] }
 0x261   :  { %v1349_v27 = vld [vmem:[#allocation2 + $0x29] sm:$0x3f]  ;;  %v1378_v5 = vpack.c.bf16 %v1375_v4, %v1374_v63 }
 0x262   :  { %v1352_v56 = vpack.c.bf16 %v1349_v27, %v1336_v44  ;;  %v1543_v7 = vld [vmem:[#allocation2 + $0x22] sm:$0xff]  ;;  %v1544_v9 = vld [vmem:[#allocation2 + $0x2a] sm:$0x3f] }
 0x263   :  { %1461 = vmatmul.bf16.gmra.mxu2 %v1378_v5  ;;  %v1547_v46 = vpack.c.bf16 %v1544_v9, %v1543_v7 }
 0x264   :  { %1533 = vmatmul.bf16.gmra.mxu3 %v1352_v56 }
 0x273   :  { %1631 = vmatmul.bf16.vlgmr.msrb.gmra.mxu2 %v1547_v46 }
 0x2ba   :  { %v1524_v11 = vpop.f32.mrf.mxu3 }
 0x2c2   :  { %v1452_v54 = vpop.f32.mrf.mxu2  ;;  %v1526_v20 = vpop.f32.mrf.mxu3 }
 0x2c3   :  { %v1525_v12 = vadd.f32 %v1524_v11, %v1452_v54 }
 0x2c4   :  { %v1622_v16 = vpop.f32.mrf.mxu0 }
 0x2c5   :  { %v1637_v52 = vadd.f32 %v1622_v16, %v1525_v12 }
 0x2c7   :  { %v1647_v21 = vadd.f32 %v2280_v35, %v1637_v52 }
 0x2c9   :  { %v1653_v6 = vadd.f32 %v1647_v21, %v2773_v42 }
 0x2ca   :  { %v1454_v22 = vpop.f32.mrf.mxu2  ;;  %v1529_v19 = vpop.f32.mrf.mxu3 }
 0x2cb   :  { %v1659_v23 = vmul.f32 %v1653_v6, %v2673_v8  ;;  %v1527_v25 = vadd.f32 %v1526_v20, %v1454_v22 }
 0x2cc   :  { %v1624_v26 = vpop.f32.mrf.mxu0 }
 0x2cd   :  { %1665 = vst [vmem:[%s3012_s12 + $0x1] sm:$0xff] %v1659_v23  ;;  %v1638_v15 = vadd.f32 %v1624_v26, %v1527_v25 }
 0x2cf   :  { %v1648_v28 = vadd.f32 %v2280_v35, %v1638_v15 }
 0x2d1   :  { %v1654_v3 = vadd.f32 %v1648_v28, %v2779_v50 }
 0x2d2   :  { %v1457_v29 = vpop.f32.mrf.mxu2  ;;  %v1531_v39 = vpop.f32.mrf.mxu3 }
 0x2d3   :  { %v1660_v30 = vmul.f32 %v1654_v3, %v2684_v36  ;;  %v1530_v37 = vadd.f32 %v1529_v19, %v1457_v29 }
 0x2d5   :  { %1666 = vst [vmem:[%s3012_s12 + $0x9] sm:$0xff] %v1660_v30 }
 0x2d6   :  { %v1627_v8 = vpop.f32.mrf.mxu0 }
 0x2d7   :  { %v1639_v42 = vadd.f32 %v1627_v8, %v1530_v37 }
 0x2d9   :  { %v1649_v38 = vadd.f32 %v2280_v35, %v1639_v42 }
 0x2da   :  { %v1459_v55 = vpop.f32.mrf.mxu2 }
 0x2db   :  { %v1655_v40 = vadd.f32 %v1649_v38, %v2787_v62  ;;  %v1532_v41 = vadd.f32 %v1531_v39, %v1459_v55 }
 0x2dd   :  { %v1661_v43 = vmul.f32 %v1655_v40, %v2692_v58 }
 0x2de   :  { %v1629_v33 = vpop.f32.mrf.mxu0 }
 0x2df   :  { %1667 = vst [vmem:[%s3012_s12 + $0x11] sm:$0xff] %v1661_v43  ;;  %v1640_v36 = vadd.f32 %v1629_v33, %v1532_v41 }
 0x2e1   :  { %v1650_v50 = vadd.f32 %v2280_v35, %v1640_v36 }
 0x2e3   :  { %v1656_v0 = vadd.f32 %v1650_v50, %v2793_v1 }
 0x2e5   :  { %v1662_v18 = vmul.f32 %v1656_v0, %v2697_v14 }
 0x2e6   :  { %v1462_v44 = vpop.f32.mrf.mxu2 }
 0x2e7   :  { %1668 = vst [vmem:[%s3012_s12 + $0x19] sm:$0xff] %v1662_v18  ;;  %v1534_v45 = vpop.f32.mrf.mxu3 }
 0x2e8   :  { %v1535_v48 = vadd.f32 %v1534_v45, %v1462_v44 }
 0x2ee   :  { %v1464_v62 = vpop.f32.mrf.mxu2 }
 0x2ef   :  { %v1536_v17 = vpop.f32.mrf.mxu3 }
 0x2f0   :  { %v1537_v10 = vadd.f32 %v1536_v17, %v1464_v62 }
 0x2f6   :  { %v1632_v58 = vpop.f32.mrf.mxu2 }
 0x2f7   :  { %v1641_v49 = vadd.f32 %v1632_v58, %v1535_v48 }
 0x2f9   :  { %v1651_v51 = vadd.f32 %v2280_v35, %v1641_v49 }
 0x2fb   :  { %v1657_v53 = vadd.f32 %v1651_v51, %v2801_v24 }
 0x2fd   :  { %v1663_v57 = vmul.f32 %v1657_v53, %v2701_v31 }
 0x2fe   :  { %v1634_v1 = vpop.f32.mrf.mxu2 }
 0x2ff   :  { %1669 = vst [vmem:[%s3012_s12 + $0x21] sm:$0xff] %v1663_v57  ;;  %v1642_v14 = vadd.f32 %v1634_v1, %v1537_v10 }
 0x301   :  { %v1652_v13 = vadd.f32 %v2280_v35, %v1642_v14 }
 0x303   :  { %v1658_v59 = vadd.f32 %v1652_v13, %v2807_v34 }
 0x305   :  { %v1664_v60 = vmul.f32 %v1658_v59, %v2705_v47 }
 0x307   :  { %1670 = vst [vmem:[%s3012_s12 + $0x29] sm:$0x3f] %v1664_v60 }
 0x308   :  { %1677 = vsyncpa [#allocation4], 1 }
 0x309   :  { %1678 = vsyncpa [#allocation6], 1 }

</bundles_post_ra>
